<compile_context>
chip_gen: v6e
topology: v6e:2x2x1
jax: 0.10.0
libtpu: 0.0.40
codegen_flags: <defaults>
</compile_context>

<pallas_src>
import functools
import math

import jax
import jax.numpy as jnp
from jax.experimental import pallas as pl
from jax.experimental.pallas import tpu as pltpu


# ----------------------------------------------------------------------------
# Fused kernel: one grid step == one BasicTransformerLayer over the full batch.
# Carried state:
#   tgt   -> output ref (constant block index across the layer axis)
#   key/value -> VMEM scratch (key accumulates pos_src each layer)
# ----------------------------------------------------------------------------
def fused_transformer_kernel(nhead, use_key_pos, use_query_pos, update_kv,
                             q0_ref, k0_ref, v0_ref, ps_ref, pq_ref,
                             wq_ref, bq_ref, wk_ref, bk_ref, wv_ref, bv_ref,
                             wo_ref, bo_ref, g1_ref, be1_ref,
                             w1_ref, b1_ref, w2_ref, b2_ref, g2_ref, be2_ref,
                             tgt_ref, attn_ref,
                             key_st, val_st):
    eps = 1e-5
    N, L, E = tgt_ref.shape
    S = k0_ref.shape[1]
    hd = E // nhead

    layer = pl.program_id(0)

    @pl.when(layer == 0)
    def _init():
        tgt_ref[...] = q0_ref[...]
        key_st[...] = k0_ref[...]
        val_st[...] = v0_ref[...]

    if use_key_pos:                       # static flag
        key_st[...] = key_st[...] + ps_ref[...]

    q_in = tgt_ref[...]                   # carried tgt from previous layer
    if use_query_pos:                     # static flag
        q_in = q_in + pq_ref[...]

    xq = q_in.reshape(N * L, E)
    xk = key_st[...].reshape(N * S, E)
    xv = val_st[...].reshape(N * S, E)

    attn_sum = jnp.zeros((N, L, S), jnp.float32)
    attn_out = jnp.zeros((N * L, E), jnp.float32)
    for h in range(nhead):                # static loop; weights pre-split per head
        qh = (jnp.dot(xq, wq_ref[h], preferred_element_type=jnp.float32)
              + bq_ref[h]).reshape(N, L, hd)          # scale folded into wq/bq
        kh = (jnp.dot(xk, wk_ref[h], preferred_element_type=jnp.float32)
              + bk_ref[h]).reshape(N, S, hd)
        vh = (jnp.dot(xv, wv_ref[h], preferred_element_type=jnp.float32)
              + bv_ref[h]).reshape(N, S, hd)
        s = jnp.einsum('nld,nsd->nls', qh, kh,
                       preferred_element_type=jnp.float32)
        s = s - jnp.max(s, axis=-1, keepdims=True)
        p = jnp.exp(s)
        # NOTE: pl.reciprocal(denom, approx=True) would push this onto the EUP;
        # kept exact here for tight numerical agreement with the f32 reference.
        p = p / jnp.sum(p, axis=-1, keepdims=True)
        attn_sum = attn_sum + p
        ctx = jnp.einsum('nls,nsd->nld', p, vh,
                         preferred_element_type=jnp.float32)
        attn_out = attn_out + jnp.dot(ctx.reshape(N * L, hd), wo_ref[h],
                                      preferred_element_type=jnp.float32)

    attn_ref[...] = attn_sum * (1.0 / nhead)          # average_attn_weights=True
    o = attn_out + bo_ref[...]

    # residual + LayerNorm 1
    x = xq + o
    mu = jnp.mean(x, axis=-1, keepdims=True)
    var = jnp.mean((x - mu) ** 2, axis=-1, keepdims=True)
    x = (x - mu) * jax.lax.rsqrt(var + eps) * g1_ref[...] + be1_ref[...]

    # feed-forward (relu)
    hmid = jnp.maximum(
        jnp.dot(x, w1_ref[...], preferred_element_type=jnp.float32)
        + b1_ref[...], 0.0)
    y = jnp.dot(hmid, w2_ref[...], preferred_element_type=jnp.float32) + b2_ref[...]

    # residual + LayerNorm 2
    x = x + y
    mu2 = jnp.mean(x, axis=-1, keepdims=True)
    var2 = jnp.mean((x - mu2) ** 2, axis=-1, keepdims=True)
    tgt_new = (x - mu2) * jax.lax.rsqrt(var2 + eps) * g2_ref[...] + be2_ref[...]

    tgt3 = tgt_new.reshape(N, L, E)
    tgt_ref[...] = tgt3
    if update_kv:                         # static flag (requires L == S)
        key_st[...] = tgt3
        val_st[...] = tgt3


# ----------------------------------------------------------------------------
# Wrapper-side weight preprocessing: pre-transpose, head-split, fold the
# 1/sqrt(head_dim) scale into the Q projection, stack across layers.
# ----------------------------------------------------------------------------
def pack_layer_params(layer_params, nhead):
    E = layer_params[0]["wq"].shape[0]
    Fdim = layer_params[0]["w1"].shape[0]
    hd = E // nhead
    scale = 1.0 / math.sqrt(hd)

    def head_split_in(w, b, s=1.0):
        # PyTorch Linear: y = x @ w.T + b   (w: [E_out, E_in])
        wt = (w.T * s).reshape(E, nhead, hd).transpose(1, 0, 2)   # [H, E, hd]
        bh = (b.reshape(nhead, hd) * s).reshape(nhead, 1, hd)     # [H, 1, hd]
        return wt, bh

    keys = ("wq", "bq", "wk", "bk", "wv", "bv", "wo", "bo",
            "g1", "be1", "w1", "b1", "w2", "b2", "g2", "be2")
    acc = {k: [] for k in keys}
    for p in layer_params:
        wq, bq = head_split_in(p["wq"], p["bq"], scale)
        wk, bk = head_split_in(p["wk"], p["bk"])
        wv, bv = head_split_in(p["wv"], p["bv"])
        acc["wq"].append(wq); acc["bq"].append(bq)
        acc["wk"].append(wk); acc["bk"].append(bk)
        acc["wv"].append(wv); acc["bv"].append(bv)
        acc["wo"].append(p["wo"].T.reshape(nhead, hd, E))   # [H, hd, E]
        acc["bo"].append(p["bo"].reshape(1, E))
        acc["g1"].append(p["gamma1"].reshape(1, E))
        acc["be1"].append(p["beta1"].reshape(1, E))
        acc["w1"].append(p["w1"].T)                         # [E, F]
        acc["b1"].append(p["b1"].reshape(1, Fdim))
        acc["w2"].append(p["w2"].T)                         # [F, E]
        acc["b2"].append(p["b2"].reshape(1, E))
        acc["g2"].append(p["gamma2"].reshape(1, E))
        acc["be2"].append(p["beta2"].reshape(1, E))
    return {k: jnp.stack(v) for k, v in acc.items()}


# ----------------------------------------------------------------------------
# Public wrapper: whole BasicTransformer forward in one pallas_call.
# ----------------------------------------------------------------------------
def basic_transformer_pallas(layer_params, key_sne, value_sne, query_lne,
                             pos_src, pos_query, nhead,
                             use_key_pos=True, use_query_pos=True,
                             update_key_value_using_query=False):
    S, N, E = key_sne.shape
    L = query_lne.shape[0]
    num_layers = len(layer_params)
    Fdim = layer_params[0]["w1"].shape[0]
    hd = E // nhead
    assert E % nhead == 0
    if update_key_value_using_query:
        assert L == S, "update_key_value_using_query requires key len == query len"

    packed = pack_layer_params(layer_params, nhead)

    to_batch_major = lambda x: jnp.transpose(x, (1, 0, 2))   # seq-first -> batch-major
    q0 = to_batch_major(query_lne)
    k0 = to_batch_major(key_sne)
    v0 = to_batch_major(value_sne)
    ps = (to_batch_major(pos_src) if (use_key_pos and pos_src is not None)
          else jnp.zeros((N, S, E), jnp.float32))
    pq = (to_batch_major(pos_query) if (use_query_pos and pos_query is not None)
          else jnp.zeros((N, L, E), jnp.float32))

    def full_spec(shape):                 # layer-invariant input (fetched once)
        return pl.BlockSpec(shape, lambda l: (0,) * len(shape))

    def layer_spec(shape):                # per-layer slab, layer dim squeezed
        return pl.BlockSpec((None,) + shape, lambda l: (l,) + (0,) * len(shape))

    in_specs = [
        full_spec((N, L, E)), full_spec((N, S, E)), full_spec((N, S, E)),
        full_spec((N, S, E)), full_spec((N, L, E)),
        layer_spec((nhead, E, hd)), layer_spec((nhead, 1, hd)),
        layer_spec((nhead, E, hd)), layer_spec((nhead, 1, hd)),
        layer_spec((nhead, E, hd)), layer_spec((nhead, 1, hd)),
        layer_spec((nhead, hd, E)), layer_spec((1, E)),
        layer_spec((1, E)), layer_spec((1, E)),
        layer_spec((E, Fdim)), layer_spec((1, Fdim)),
        layer_spec((Fdim, E)), layer_spec((1, E)),
        layer_spec((1, E)), layer_spec((1, E)),
    ]
    out_specs = [
        pl.BlockSpec((N, L, E), lambda l: (0, 0, 0)),   # resident carried tgt
        pl.BlockSpec((N, L, S), lambda l: (0, 0, 0)),   # last layer's attn map
    ]
    out_shape = (
        jax.ShapeDtypeStruct((N, L, E), jnp.float32),
        jax.ShapeDtypeStruct((N, L, S), jnp.float32),
    )

    kernel = functools.partial(
        fused_transformer_kernel, nhead, use_key_pos, use_query_pos,
        update_key_value_using_query)

    tgt_nle, attn_nls = pl.pallas_call(
        kernel,
        out_shape=out_shape,
        grid_spec=pltpu.PrefetchScalarGridSpec(
            num_scalar_prefetch=0,
            grid=(num_layers,),
            in_specs=in_specs,
            out_specs=out_specs,
            scratch_shapes=[pltpu.VMEM((N, S, E), jnp.float32),   # key state
                            pltpu.VMEM((N, S, E), jnp.float32)]), # value state
        compiler_params=pltpu.CompilerParams(
            dimension_semantics=("arbitrary",)),
    )(q0, k0, v0, ps, pq,
      packed["wq"], packed["bq"], packed["wk"], packed["bk"],
      packed["wv"], packed["bv"], packed["wo"], packed["bo"],
      packed["g1"], packed["be1"], packed["w1"], packed["b1"],
      packed["w2"], packed["b2"], packed["g2"], packed["be2"])

    return jnp.transpose(tgt_nle, (1, 0, 2)), attn_nls


# ----------------------------------------------------------------------------
# Pure-JAX reference (mirrors PyTorch semantics) for correctness checking.
# ----------------------------------------------------------------------------
def _ref_layer_single(params, q_in, k_in, v_in, nhead):
    eps = 1e-5
    E = q_in.shape[-1]
    head_dim = E // nhead
    scale = 1.0 / math.sqrt(head_dim)

    q = q_in @ params["wq"].T + params["bq"][0]
    k = k_in @ params["wk"].T + params["bk"][0]
    v = v_in @ params["wv"].T + params["bv"][0]

    L, S = q.shape[0], k.shape[0]
    attn_avg = jnp.zeros((L, S), jnp.float32)
    outs = []
    for h in range(nhead):
        lo, hi = h * head_dim, (h + 1) * head_dim
        s = (q[:, lo:hi] * scale) @ k[:, lo:hi].T
        s = s - jnp.max(s, axis=-1, keepdims=True)
        p = jnp.exp(s)
        p = p / jnp.sum(p, axis=-1, keepdims=True)
        attn_avg = attn_avg + p
        outs.append(p @ v[:, lo:hi])
    attn_avg = attn_avg / nhead
    o = jnp.concatenate(outs, axis=-1) @ params["wo"].T + params["bo"][0]

    x = q_in + o
    mu = jnp.mean(x, axis=-1, keepdims=True)
    var = jnp.mean((x - mu) ** 2, axis=-1, keepdims=True)
    x = (x - mu) * jax.lax.rsqrt(var + eps) * params["gamma1"][0] + params["beta1"][0]

    h1 = jnp.maximum(x @ params["w1"].T + params["b1"][0], 0.0)
    y = h1 @ params["w2"].T + params["b2"][0]
    x = x + y
    mu2 = jnp.mean(x, axis=-1, keepdims=True)
    var2 = jnp.mean((x - mu2) ** 2, axis=-1, keepdims=True)
    tgt = (x - mu2) * jax.lax.rsqrt(var2 + eps) * params["gamma2"][0] + params["beta2"][0]
    return tgt, attn_avg


def layer_forward_ref(params, key_sne, value_sne, query_lne, nhead):
    fn = lambda q, k, v: _ref_layer_single(params, q, k, v, nhead)
    tgt_nle, attn_nls = jax.vmap(fn)(
        jnp.transpose(query_lne, (1, 0, 2)),
        jnp.transpose(key_sne, (1, 0, 2)),
        jnp.transpose(value_sne, (1, 0, 2)))
    return jnp.transpose(tgt_nle, (1, 0, 2)), attn_nls


def basic_transformer_ref(layer_params, key, value, query, pos_src, pos_query,
                          nhead, use_key_pos=True, use_query_pos=True,
                          update_key_value_using_query=False):
    tgt = query
    attn_map = None
    for params in layer_params:
        if use_key_pos:
            key = key + pos_src
        if use_query_pos:
            tgt = tgt + pos_query
        tgt, attn_map = layer_forward_ref(params, key, value, tgt, nhead)
        if update_key_value_using_query:
            key = tgt
            value = tgt
    return tgt, attn_map


# ----------------------------------------------------------------------------
# Deterministic parameter init (synthetic; mirrors shapes of the PyTorch init).
# ----------------------------------------------------------------------------
def init_layer_params(rng, d_model, dim_feedforward):
    E, F = d_model, dim_feedforward
    ks = jax.random.split(rng, 10)
    w = lambda k, shape, s: (jax.random.normal(k, shape, jnp.float32) * s)
    in_proj = w(ks[0], (3 * E, E), 1.0 / math.sqrt(E))
    return dict(
        wq=in_proj[:E], wk=in_proj[E:2 * E], wv=in_proj[2 * E:],
        bq=w(ks[1], (1, E), 0.02),
        bk=w(ks[2], (1, E), 0.02),
        bv=w(ks[3], (1, E), 0.02),
        wo=w(ks[4], (E, E), 1.0 / math.sqrt(E)),
        bo=w(ks[5], (1, E), 0.02),
        gamma1=jnp.ones((1, E), jnp.float32),
        beta1=jnp.zeros((1, E), jnp.float32),
        w1=w(ks[6], (F, E), 1.0 / math.sqrt(E)),
        b1=w(ks[7], (1, F), 0.02),
        w2=w(ks[8], (E, F), 1.0 / math.sqrt(F)),
        b2=w(ks[9], (1, E), 0.02),
        gamma2=jnp.ones((1, E), jnp.float32),
        beta2=jnp.zeros((1, E), jnp.float32),
    )


if __name__ == "__main__":
    num_layers = 2
    d_model = 32
    nhead = 4
    dim_feedforward = 64
    L, S, N = 8, 8, 2          # query len, key/value len, batch

    root = jax.random.PRNGKey(0)
    k_inp, k_par = jax.random.split(root)
    ki = jax.random.split(k_inp, 5)
    key_t = jax.random.normal(ki[0], (S, N, d_model), jnp.float32)
    value_t = jax.random.normal(ki[1], (S, N, d_model), jnp.float32)
    query_t = jax.random.normal(ki[2], (L, N, d_model), jnp.float32)
    pos_src = jax.random.normal(ki[3], (S, N, d_model), jnp.float32) * 0.1
    pos_query = jax.random.normal(ki[4], (L, N, d_model), jnp.float32) * 0.1

    layer_keys = jax.random.split(k_par, num_layers)
    layer_params = [init_layer_params(k, d_model, dim_feedforward)
                    for k in layer_keys]

    fwd = jax.jit(functools.partial(basic_transformer_pallas, nhead=nhead))
    tgt, attn_map = fwd(layer_params, key_t, value_t, query_t, pos_src, pos_query)
    tgt = jax.block_until_ready(tgt)
    attn_map = jax.block_until_ready(attn_map)

    tgt_ref, attn_ref = basic_transformer_ref(
        layer_params, key_t, value_t, query_t, pos_src, pos_query, nhead)

    assert tgt.shape == (L, N, d_model)
    assert attn_map.shape == (N, L, S)
    assert jnp.allclose(tgt, tgt_ref, rtol=2e-4, atol=2e-4), \
        float(jnp.max(jnp.abs(tgt - tgt_ref)))
    assert jnp.allclose(attn_map, attn_ref, rtol=2e-4, atol=2e-4), \
        float(jnp.max(jnp.abs(attn_map - attn_ref)))
    print("KERNEL_OK")
</pallas_src>

<mosaic_0001>
module attributes {stable_mosaic.version = 11 : i64} {
  func.func @fused_transformer_kernel(%arg0: i32, %arg1: memref<2x8x32xf32, #tpu.memory_space<vmem>>, %arg2: memref<2x8x32xf32, #tpu.memory_space<vmem>>, %arg3: memref<2x8x32xf32, #tpu.memory_space<vmem>>, %arg4: memref<2x8x32xf32, #tpu.memory_space<vmem>>, %arg5: memref<2x8x32xf32, #tpu.memory_space<vmem>>, %arg6: memref<1x4x32x8xf32, #tpu.memory_space<vmem>>, %arg7: memref<1x4x1x8xf32, #tpu.memory_space<vmem>>, %arg8: memref<1x4x32x8xf32, #tpu.memory_space<vmem>>, %arg9: memref<1x4x1x8xf32, #tpu.memory_space<vmem>>, %arg10: memref<1x4x32x8xf32, #tpu.memory_space<vmem>>, %arg11: memref<1x4x1x8xf32, #tpu.memory_space<vmem>>, %arg12: memref<1x4x8x32xf32, #tpu.memory_space<vmem>>, %arg13: memref<1x1x32xf32, #tpu.memory_space<vmem>>, %arg14: memref<1x1x32xf32, #tpu.memory_space<vmem>>, %arg15: memref<1x1x32xf32, #tpu.memory_space<vmem>>, %arg16: memref<1x32x64xf32, #tpu.memory_space<vmem>>, %arg17: memref<1x1x64xf32, #tpu.memory_space<vmem>>, %arg18: memref<1x64x32xf32, #tpu.memory_space<vmem>>, %arg19: memref<1x1x32xf32, #tpu.memory_space<vmem>>, %arg20: memref<1x1x32xf32, #tpu.memory_space<vmem>>, %arg21: memref<1x1x32xf32, #tpu.memory_space<vmem>>, %arg22: memref<2x8x32xf32, #tpu.memory_space<vmem>>, %arg23: memref<2x8x8xf32, #tpu.memory_space<vmem>>, %arg24: memref<2x8x32xf32, #tpu.memory_space<vmem>>, %arg25: memref<2x8x32xf32, #tpu.memory_space<vmem>>) attributes {dimension_semantics = [#tpu.dimension_semantics<arbitrary>], iteration_bounds = array<i64: 2>, scalar_prefetch = 0 : i64, scratch_operands = 2 : i64, tpu.core_type = #tpu.core_type<tc>, window_params = [{pipeline_mode = #tpu.pipeline_mode<synchronous>, transform_indices = @transform_0, window_bounds = array<i64: 2, 8, 32>}, {pipeline_mode = #tpu.pipeline_mode<synchronous>, transform_indices = @transform_1, window_bounds = array<i64: 2, 8, 32>}, {pipeline_mode = #tpu.pipeline_mode<synchronous>, transform_indices = @transform_2, window_bounds = array<i64: 2, 8, 32>}, {pipeline_mode = #tpu.pipeline_mode<synchronous>, transform_indices = @transform_3, window_bounds = array<i64: 2, 8, 32>}, {pipeline_mode = #tpu.pipeline_mode<synchronous>, transform_indices = @transform_4, window_bounds = array<i64: 2, 8, 32>}, {transform_indices = @transform_5, window_bounds = array<i64: 1, 4, 32, 8>}, {transform_indices = @transform_6, window_bounds = array<i64: 1, 4, 1, 8>}, {transform_indices = @transform_7, window_bounds = array<i64: 1, 4, 32, 8>}, {transform_indices = @transform_8, window_bounds = array<i64: 1, 4, 1, 8>}, {transform_indices = @transform_9, window_bounds = array<i64: 1, 4, 32, 8>}, {transform_indices = @transform_10, window_bounds = array<i64: 1, 4, 1, 8>}, {transform_indices = @transform_11, window_bounds = array<i64: 1, 4, 8, 32>}, {transform_indices = @transform_12, window_bounds = array<i64: 1, 1, 32>}, {transform_indices = @transform_13, window_bounds = array<i64: 1, 1, 32>}, {transform_indices = @transform_14, window_bounds = array<i64: 1, 1, 32>}, {transform_indices = @transform_15, window_bounds = array<i64: 1, 32, 64>}, {transform_indices = @transform_16, window_bounds = array<i64: 1, 1, 64>}, {transform_indices = @transform_17, window_bounds = array<i64: 1, 64, 32>}, {transform_indices = @transform_18, window_bounds = array<i64: 1, 1, 32>}, {transform_indices = @transform_19, window_bounds = array<i64: 1, 1, 32>}, {transform_indices = @transform_20, window_bounds = array<i64: 1, 1, 32>}, {pipeline_mode = #tpu.pipeline_mode<synchronous>, transform_indices = @transform_21, window_bounds = array<i64: 2, 8, 32>}, {pipeline_mode = #tpu.pipeline_mode<synchronous>, transform_indices = @transform_22, window_bounds = array<i64: 2, 8, 8>}]} {
    %c0_i32 = arith.constant 0 : i32
    %0 = arith.cmpi eq, %arg0, %c0_i32 : i32
    %1 = arith.extui %0 : i1 to i32
    %c0_i32_0 = arith.constant 0 : i32
    %2 = arith.cmpi ne, %1, %c0_i32_0 : i32
    scf.if %2 {
      %c0_210 = arith.constant 0 : index
      %c0_211 = arith.constant 0 : index
      %c0_212 = arith.constant 0 : index
      %260 = vector.load %arg1[%c0_210, %c0_211, %c0_212] : memref<2x8x32xf32, #tpu.memory_space<vmem>>, vector<2x8x32xf32>
      %c0_213 = arith.constant 0 : index
      %c0_214 = arith.constant 0 : index
      %c0_215 = arith.constant 0 : index
      %261 = vector.load %arg22[%c0_213, %c0_214, %c0_215] : memref<2x8x32xf32, #tpu.memory_space<vmem>>, vector<2x8x32xf32>
      tpu.vector_store %arg22[%c0_213, %c0_214, %c0_215], %260 {strides = array<i32>} : memref<2x8x32xf32, #tpu.memory_space<vmem>>, vector<2x8x32xf32>,
      %c0_216 = arith.constant 0 : index
      %c0_217 = arith.constant 0 : index
      %c0_218 = arith.constant 0 : index
      %262 = vector.load %arg2[%c0_216, %c0_217, %c0_218] : memref<2x8x32xf32, #tpu.memory_space<vmem>>, vector<2x8x32xf32>
      %c0_219 = arith.constant 0 : index
      %c0_220 = arith.constant 0 : index
      %c0_221 = arith.constant 0 : index
      %263 = vector.load %arg24[%c0_219, %c0_220, %c0_221] : memref<2x8x32xf32, #tpu.memory_space<vmem>>, vector<2x8x32xf32>
      tpu.vector_store %arg24[%c0_219, %c0_220, %c0_221], %262 {strides = array<i32>} : memref<2x8x32xf32, #tpu.memory_space<vmem>>, vector<2x8x32xf32>,
      %c0_222 = arith.constant 0 : index
      %c0_223 = arith.constant 0 : index
      %c0_224 = arith.constant 0 : index
      %264 = vector.load %arg3[%c0_222, %c0_223, %c0_224] : memref<2x8x32xf32, #tpu.memory_space<vmem>>, vector<2x8x32xf32>
      %c0_225 = arith.constant 0 : index
      %c0_226 = arith.constant 0 : index
      %c0_227 = arith.constant 0 : index
      %265 = vector.load %arg25[%c0_225, %c0_226, %c0_227] : memref<2x8x32xf32, #tpu.memory_space<vmem>>, vector<2x8x32xf32>
      tpu.vector_store %arg25[%c0_225, %c0_226, %c0_227], %264 {strides = array<i32>} : memref<2x8x32xf32, #tpu.memory_space<vmem>>, vector<2x8x32xf32>,
    } else {
    }
    %c0 = arith.constant 0 : index
    %c0_1 = arith.constant 0 : index
    %c0_2 = arith.constant 0 : index
    %3 = vector.load %arg24[%c0, %c0_1, %c0_2] : memref<2x8x32xf32, #tpu.memory_space<vmem>>, vector<2x8x32xf32>
    %c0_3 = arith.constant 0 : index
    %c0_4 = arith.constant 0 : index
    %c0_5 = arith.constant 0 : index
    %4 = vector.load %arg4[%c0_3, %c0_4, %c0_5] : memref<2x8x32xf32, #tpu.memory_space<vmem>>, vector<2x8x32xf32>
    %5 = arith.addf %3, %4 : vector<2x8x32xf32>
    %c0_6 = arith.constant 0 : index
    %c0_7 = arith.constant 0 : index
    %c0_8 = arith.constant 0 : index
    %6 = vector.load %arg24[%c0_6, %c0_7, %c0_8] : memref<2x8x32xf32, #tpu.memory_space<vmem>>, vector<2x8x32xf32>
    tpu.vector_store %arg24[%c0_6, %c0_7, %c0_8], %5 {strides = array<i32>} : memref<2x8x32xf32, #tpu.memory_space<vmem>>, vector<2x8x32xf32>,
    %c0_9 = arith.constant 0 : index
    %c0_10 = arith.constant 0 : index
    %c0_11 = arith.constant 0 : index
    %7 = vector.load %arg22[%c0_9, %c0_10, %c0_11] : memref<2x8x32xf32, #tpu.memory_space<vmem>>, vector<2x8x32xf32>
    %c0_12 = arith.constant 0 : index
    %c0_13 = arith.constant 0 : index
    %c0_14 = arith.constant 0 : index
    %8 = vector.load %arg5[%c0_12, %c0_13, %c0_14] : memref<2x8x32xf32, #tpu.memory_space<vmem>>, vector<2x8x32xf32>
    %9 = arith.addf %7, %8 : vector<2x8x32xf32>
    %10 = vector.shape_cast %9 : vector<2x8x32xf32> to vector<16x32xf32>
    %c0_15 = arith.constant 0 : index
    %c0_16 = arith.constant 0 : index
    %c0_17 = arith.constant 0 : index
    %11 = vector.load %arg24[%c0_15, %c0_16, %c0_17] : memref<2x8x32xf32, #tpu.memory_space<vmem>>, vector<2x8x32xf32>
    %12 = vector.shape_cast %11 : vector<2x8x32xf32> to vector<16x32xf32>
    %c0_18 = arith.constant 0 : index
    %c0_19 = arith.constant 0 : index
    %c0_20 = arith.constant 0 : index
    %13 = vector.load %arg25[%c0_18, %c0_19, %c0_20] : memref<2x8x32xf32, #tpu.memory_space<vmem>>, vector<2x8x32xf32>
    %14 = vector.shape_cast %13 : vector<2x8x32xf32> to vector<16x32xf32>
    %cst = arith.constant 0.000000e+00 : f32
    %15 = vector.broadcast %cst : f32 to vector<2x8x8xf32>
    %cst_21 = arith.constant 0.000000e+00 : f32
    %16 = vector.broadcast %cst_21 : f32 to vector<16x32xf32>
    %c0_22 = arith.constant 0 : index
    %c0_23 = arith.constant 0 : index
    %c0_24 = arith.constant 0 : index
    %c0_25 = arith.constant 0 : index
    %17 = vector.load %arg6[%c0_22, %c0_23, %c0_24, %c0_25] : memref<1x4x32x8xf32, #tpu.memory_space<vmem>>, vector<1x1x32x8xf32>
    %18 = vector.shape_cast %17 : vector<1x1x32x8xf32> to vector<32x8xf32>
    %cst_26 = arith.constant dense<0.000000e+00> : vector<16x8xf32>
    %19 = tpu.matmul %10, %18, %cst_26 {dimension_numbers = #tpu.dot_dimension_numbers<[1], [0], [0], [1], [0, 0, 1, 1], [], []>} : vector<16x32xf32>, vector<32x8xf32>, vector<16x8xf32> -> vector<16x8xf32>
    %c0_27 = arith.constant 0 : index
    %c0_28 = arith.constant 0 : index
    %c0_29 = arith.constant 0 : index
    %c0_30 = arith.constant 0 : index
    %20 = vector.load %arg7[%c0_27, %c0_28, %c0_29, %c0_30] : memref<1x4x1x8xf32, #tpu.memory_space<vmem>>, vector<1x1x1x8xf32>
    %21 = vector.shape_cast %20 : vector<1x1x1x8xf32> to vector<1x8xf32>
    %22 = vector.broadcast %21 : vector<1x8xf32> to vector<16x8xf32>
    %23 = arith.addf %19, %22 : vector<16x8xf32>
    %24 = vector.shape_cast %23 : vector<16x8xf32> to vector<2x8x8xf32>
    %c0_31 = arith.constant 0 : index
    %c0_32 = arith.constant 0 : index
    %c0_33 = arith.constant 0 : index
    %c0_34 = arith.constant 0 : index
    %25 = vector.load %arg8[%c0_31, %c0_32, %c0_33, %c0_34] : memref<1x4x32x8xf32, #tpu.memory_space<vmem>>, vector<1x1x32x8xf32>
    %26 = vector.shape_cast %25 : vector<1x1x32x8xf32> to vector<32x8xf32>
    %cst_35 = arith.constant dense<0.000000e+00> : vector<16x8xf32>
    %27 = tpu.matmul %12, %26, %cst_35 {dimension_numbers = #tpu.dot_dimension_numbers<[1], [0], [0], [1], [0, 0, 1, 1], [], []>} : vector<16x32xf32>, vector<32x8xf32>, vector<16x8xf32> -> vector<16x8xf32>
    %c0_36 = arith.constant 0 : index
    %c0_37 = arith.constant 0 : index
    %c0_38 = arith.constant 0 : index
    %c0_39 = arith.constant 0 : index
    %28 = vector.load %arg9[%c0_36, %c0_37, %c0_38, %c0_39] : memref<1x4x1x8xf32, #tpu.memory_space<vmem>>, vector<1x1x1x8xf32>
    %29 = vector.shape_cast %28 : vector<1x1x1x8xf32> to vector<1x8xf32>
    %30 = vector.broadcast %29 : vector<1x8xf32> to vector<16x8xf32>
    %31 = arith.addf %27, %30 : vector<16x8xf32>
    %32 = vector.shape_cast %31 : vector<16x8xf32> to vector<2x8x8xf32>
    %c0_40 = arith.constant 0 : index
    %c0_41 = arith.constant 0 : index
    %c0_42 = arith.constant 0 : index
    %c0_43 = arith.constant 0 : index
    %33 = vector.load %arg10[%c0_40, %c0_41, %c0_42, %c0_43] : memref<1x4x32x8xf32, #tpu.memory_space<vmem>>, vector<1x1x32x8xf32>
    %34 = vector.shape_cast %33 : vector<1x1x32x8xf32> to vector<32x8xf32>
    %cst_44 = arith.constant dense<0.000000e+00> : vector<16x8xf32>
    %35 = tpu.matmul %14, %34, %cst_44 {dimension_numbers = #tpu.dot_dimension_numbers<[1], [0], [0], [1], [0, 0, 1, 1], [], []>} : vector<16x32xf32>, vector<32x8xf32>, vector<16x8xf32> -> vector<16x8xf32>
    %c0_45 = arith.constant 0 : index
    %c0_46 = arith.constant 0 : index
    %c0_47 = arith.constant 0 : index
    %c0_48 = arith.constant 0 : index
    %36 = vector.load %arg11[%c0_45, %c0_46, %c0_47, %c0_48] : memref<1x4x1x8xf32, #tpu.memory_space<vmem>>, vector<1x1x1x8xf32>
    %37 = vector.shape_cast %36 : vector<1x1x1x8xf32> to vector<1x8xf32>
    %38 = vector.broadcast %37 : vector<1x8xf32> to vector<16x8xf32>
    %39 = arith.addf %35, %38 : vector<16x8xf32>
    %40 = vector.shape_cast %39 : vector<16x8xf32> to vector<2x8x8xf32>
    "tpu.trace_start"() <{level = 10 : i32, message = "nld,nsd->nls"}> : () -> ()
    %cst_49 = arith.constant dense<0.000000e+00> : vector<2x8x8xf32>
    %41 = tpu.matmul %24, %32, %cst_49 {dimension_numbers = #tpu.dot_dimension_numbers<[2], [2], [1], [1], [0, 0, 0, 1, 1, 1], [0], [0]>} : vector<2x8x8xf32>, vector<2x8x8xf32>, vector<2x8x8xf32> -> vector<2x8x8xf32>
    "tpu.trace_stop"() : () -> ()
    %cst_50 = arith.constant dense<0xFF800000> : vector<2x8xf32>
    %42 = vector.multi_reduction <maximumf>, %41, %cst_50 [2] : vector<2x8x8xf32> to vector<2x8xf32>
    %43 = vector.shape_cast %42 : vector<2x8xf32> to vector<2x8x1xf32>
    %44 = vector.broadcast %43 : vector<2x8x1xf32> to vector<2x8x8xf32>
    %45 = arith.subf %41, %44 : vector<2x8x8xf32>
    %46 = math.exp %45 : vector<2x8x8xf32>
    %cst_51 = arith.constant dense<0.000000e+00> : vector<2x8xf32>
    %47 = vector.multi_reduction <add>, %46, %cst_51 [2] : vector<2x8x8xf32> to vector<2x8xf32>
    %48 = vector.shape_cast %47 : vector<2x8xf32> to vector<2x8x1xf32>
    %49 = vector.broadcast %48 : vector<2x8x1xf32> to vector<2x8x8xf32>
    %50 = arith.divf %46, %49 : vector<2x8x8xf32>
    %51 = arith.addf %15, %50 : vector<2x8x8xf32>
    "tpu.trace_start"() <{level = 10 : i32, message = "nls,nsd->nld"}> : () -> ()
    %cst_52 = arith.constant dense<0.000000e+00> : vector<2x8x8xf32>
    %52 = tpu.matmul %50, %40, %cst_52 {dimension_numbers = #tpu.dot_dimension_numbers<[2], [1], [1], [2], [0, 0, 0, 1, 1, 2], [0], [0]>} : vector<2x8x8xf32>, vector<2x8x8xf32>, vector<2x8x8xf32> -> vector<2x8x8xf32>
    "tpu.trace_stop"() : () -> ()
    %53 = vector.shape_cast %52 : vector<2x8x8xf32> to vector<16x8xf32>
    %c0_53 = arith.constant 0 : index
    %c0_54 = arith.constant 0 : index
    %c0_55 = arith.constant 0 : index
    %c0_56 = arith.constant 0 : index
    %54 = vector.load %arg12[%c0_53, %c0_54, %c0_55, %c0_56] : memref<1x4x8x32xf32, #tpu.memory_space<vmem>>, vector<1x1x8x32xf32>
    %55 = vector.shape_cast %54 : vector<1x1x8x32xf32> to vector<8x32xf32>
    %cst_57 = arith.constant dense<0.000000e+00> : vector<16x32xf32>
    %56 = tpu.matmul %53, %55, %cst_57 {dimension_numbers = #tpu.dot_dimension_numbers<[1], [0], [0], [1], [0, 0, 1, 1], [], []>} : vector<16x8xf32>, vector<8x32xf32>, vector<16x32xf32> -> vector<16x32xf32>
    %57 = arith.addf %16, %56 : vector<16x32xf32>
    %c0_58 = arith.constant 0 : index
    %c1 = arith.constant 1 : index
    %c0_59 = arith.constant 0 : index
    %c0_60 = arith.constant 0 : index
    %58 = vector.load %arg6[%c0_58, %c1, %c0_59, %c0_60] : memref<1x4x32x8xf32, #tpu.memory_space<vmem>>, vector<1x1x32x8xf32>
    %59 = vector.shape_cast %58 : vector<1x1x32x8xf32> to vector<32x8xf32>
    %cst_61 = arith.constant dense<0.000000e+00> : vector<16x8xf32>
    %60 = tpu.matmul %10, %59, %cst_61 {dimension_numbers = #tpu.dot_dimension_numbers<[1], [0], [0], [1], [0, 0, 1, 1], [], []>} : vector<16x32xf32>, vector<32x8xf32>, vector<16x8xf32> -> vector<16x8xf32>
    %c0_62 = arith.constant 0 : index
    %c1_63 = arith.constant 1 : index
    %c0_64 = arith.constant 0 : index
    %c0_65 = arith.constant 0 : index
    %61 = vector.load %arg7[%c0_62, %c1_63, %c0_64, %c0_65] : memref<1x4x1x8xf32, #tpu.memory_space<vmem>>, vector<1x1x1x8xf32>
    %62 = vector.shape_cast %61 : vector<1x1x1x8xf32> to vector<1x8xf32>
    %63 = vector.broadcast %62 : vector<1x8xf32> to vector<16x8xf32>
    %64 = arith.addf %60, %63 : vector<16x8xf32>
    %65 = vector.shape_cast %64 : vector<16x8xf32> to vector<2x8x8xf32>
    %c0_66 = arith.constant 0 : index
    %c1_67 = arith.constant 1 : index
    %c0_68 = arith.constant 0 : index
    %c0_69 = arith.constant 0 : index
    %66 = vector.load %arg8[%c0_66, %c1_67, %c0_68, %c0_69] : memref<1x4x32x8xf32, #tpu.memory_space<vmem>>, vector<1x1x32x8xf32>
    %67 = vector.shape_cast %66 : vector<1x1x32x8xf32> to vector<32x8xf32>
    %cst_70 = arith.constant dense<0.000000e+00> : vector<16x8xf32>
    %68 = tpu.matmul %12, %67, %cst_70 {dimension_numbers = #tpu.dot_dimension_numbers<[1], [0], [0], [1], [0, 0, 1, 1], [], []>} : vector<16x32xf32>, vector<32x8xf32>, vector<16x8xf32> -> vector<16x8xf32>
    %c0_71 = arith.constant 0 : index
    %c1_72 = arith.constant 1 : index
    %c0_73 = arith.constant 0 : index
    %c0_74 = arith.constant 0 : index
    %69 = vector.load %arg9[%c0_71, %c1_72, %c0_73, %c0_74] : memref<1x4x1x8xf32, #tpu.memory_space<vmem>>, vector<1x1x1x8xf32>
    %70 = vector.shape_cast %69 : vector<1x1x1x8xf32> to vector<1x8xf32>
    %71 = vector.broadcast %70 : vector<1x8xf32> to vector<16x8xf32>
    %72 = arith.addf %68, %71 : vector<16x8xf32>
    %73 = vector.shape_cast %72 : vector<16x8xf32> to vector<2x8x8xf32>
    %c0_75 = arith.constant 0 : index
    %c1_76 = arith.constant 1 : index
    %c0_77 = arith.constant 0 : index
    %c0_78 = arith.constant 0 : index
    %74 = vector.load %arg10[%c0_75, %c1_76, %c0_77, %c0_78] : memref<1x4x32x8xf32, #tpu.memory_space<vmem>>, vector<1x1x32x8xf32>
    %75 = vector.shape_cast %74 : vector<1x1x32x8xf32> to vector<32x8xf32>
    %cst_79 = arith.constant dense<0.000000e+00> : vector<16x8xf32>
    %76 = tpu.matmul %14, %75, %cst_79 {dimension_numbers = #tpu.dot_dimension_numbers<[1], [0], [0], [1], [0, 0, 1, 1], [], []>} : vector<16x32xf32>, vector<32x8xf32>, vector<16x8xf32> -> vector<16x8xf32>
    %c0_80 = arith.constant 0 : index
    %c1_81 = arith.constant 1 : index
    %c0_82 = arith.constant 0 : index
    %c0_83 = arith.constant 0 : index
    %77 = vector.load %arg11[%c0_80, %c1_81, %c0_82, %c0_83] : memref<1x4x1x8xf32, #tpu.memory_space<vmem>>, vector<1x1x1x8xf32>
    %78 = vector.shape_cast %77 : vector<1x1x1x8xf32> to vector<1x8xf32>
    %79 = vector.broadcast %78 : vector<1x8xf32> to vector<16x8xf32>
    %80 = arith.addf %76, %79 : vector<16x8xf32>
    %81 = vector.shape_cast %80 : vector<16x8xf32> to vector<2x8x8xf32>
    "tpu.trace_start"() <{level = 10 : i32, message = "nld,nsd->nls"}> : () -> ()
    %cst_84 = arith.constant dense<0.000000e+00> : vector<2x8x8xf32>
    %82 = tpu.matmul %65, %73, %cst_84 {dimension_numbers = #tpu.dot_dimension_numbers<[2], [2], [1], [1], [0, 0, 0, 1, 1, 1], [0], [0]>} : vector<2x8x8xf32>, vector<2x8x8xf32>, vector<2x8x8xf32> -> vector<2x8x8xf32>
    "tpu.trace_stop"() : () -> ()
    %cst_85 = arith.constant dense<0xFF800000> : vector<2x8xf32>
    %83 = vector.multi_reduction <maximumf>, %82, %cst_85 [2] : vector<2x8x8xf32> to vector<2x8xf32>
    %84 = vector.shape_cast %83 : vector<2x8xf32> to vector<2x8x1xf32>
    %85 = vector.broadcast %84 : vector<2x8x1xf32> to vector<2x8x8xf32>
    %86 = arith.subf %82, %85 : vector<2x8x8xf32>
    %87 = math.exp %86 : vector<2x8x8xf32>
    %cst_86 = arith.constant dense<0.000000e+00> : vector<2x8xf32>
    %88 = vector.multi_reduction <add>, %87, %cst_86 [2] : vector<2x8x8xf32> to vector<2x8xf32>
    %89 = vector.shape_cast %88 : vector<2x8xf32> to vector<2x8x1xf32>
    %90 = vector.broadcast %89 : vector<2x8x1xf32> to vector<2x8x8xf32>
    %91 = arith.divf %87, %90 : vector<2x8x8xf32>
    %92 = arith.addf %51, %91 : vector<2x8x8xf32>
    "tpu.trace_start"() <{level = 10 : i32, message = "nls,nsd->nld"}> : () -> ()
    %cst_87 = arith.constant dense<0.000000e+00> : vector<2x8x8xf32>
    %93 = tpu.matmul %91, %81, %cst_87 {dimension_numbers = #tpu.dot_dimension_numbers<[2], [1], [1], [2], [0, 0, 0, 1, 1, 2], [0], [0]>} : vector<2x8x8xf32>, vector<2x8x8xf32>, vector<2x8x8xf32> -> vector<2x8x8xf32>
    "tpu.trace_stop"() : () -> ()
    %94 = vector.shape_cast %93 : vector<2x8x8xf32> to vector<16x8xf32>
    %c0_88 = arith.constant 0 : index
    %c1_89 = arith.constant 1 : index
    %c0_90 = arith.constant 0 : index
    %c0_91 = arith.constant 0 : index
    %95 = vector.load %arg12[%c0_88, %c1_89, %c0_90, %c0_91] : memref<1x4x8x32xf32, #tpu.memory_space<vmem>>, vector<1x1x8x32xf32>
    %96 = vector.shape_cast %95 : vector<1x1x8x32xf32> to vector<8x32xf32>
    %cst_92 = arith.constant dense<0.000000e+00> : vector<16x32xf32>
    %97 = tpu.matmul %94, %96, %cst_92 {dimension_numbers = #tpu.dot_dimension_numbers<[1], [0], [0], [1], [0, 0, 1, 1], [], []>} : vector<16x8xf32>, vector<8x32xf32>, vector<16x32xf32> -> vector<16x32xf32>
    %98 = arith.addf %57, %97 : vector<16x32xf32>
    %c0_93 = arith.constant 0 : index
    %c2 = arith.constant 2 : index
    %c0_94 = arith.constant 0 : index
    %c0_95 = arith.constant 0 : index
    %99 = vector.load %arg6[%c0_93, %c2, %c0_94, %c0_95] : memref<1x4x32x8xf32, #tpu.memory_space<vmem>>, vector<1x1x32x8xf32>
    %100 = vector.shape_cast %99 : vector<1x1x32x8xf32> to vector<32x8xf32>
    %cst_96 = arith.constant dense<0.000000e+00> : vector<16x8xf32>
    %101 = tpu.matmul %10, %100, %cst_96 {dimension_numbers = #tpu.dot_dimension_numbers<[1], [0], [0], [1], [0, 0, 1, 1], [], []>} : vector<16x32xf32>, vector<32x8xf32>, vector<16x8xf32> -> vector<16x8xf32>
    %c0_97 = arith.constant 0 : index
    %c2_98 = arith.constant 2 : index
    %c0_99 = arith.constant 0 : index
    %c0_100 = arith.constant 0 : index
    %102 = vector.load %arg7[%c0_97, %c2_98, %c0_99, %c0_100] : memref<1x4x1x8xf32, #tpu.memory_space<vmem>>, vector<1x1x1x8xf32>
    %103 = vector.shape_cast %102 : vector<1x1x1x8xf32> to vector<1x8xf32>
    %104 = vector.broadcast %103 : vector<1x8xf32> to vector<16x8xf32>
    %105 = arith.addf %101, %104 : vector<16x8xf32>
    %106 = vector.shape_cast %105 : vector<16x8xf32> to vector<2x8x8xf32>
    %c0_101 = arith.constant 0 : index
    %c2_102 = arith.constant 2 : index
    %c0_103 = arith.constant 0 : index
    %c0_104 = arith.constant 0 : index
    %107 = vector.load %arg8[%c0_101, %c2_102, %c0_103, %c0_104] : memref<1x4x32x8xf32, #tpu.memory_space<vmem>>, vector<1x1x32x8xf32>
    %108 = vector.shape_cast %107 : vector<1x1x32x8xf32> to vector<32x8xf32>
    %cst_105 = arith.constant dense<0.000000e+00> : vector<16x8xf32>
    %109 = tpu.matmul %12, %108, %cst_105 {dimension_numbers = #tpu.dot_dimension_numbers<[1], [0], [0], [1], [0, 0, 1, 1], [], []>} : vector<16x32xf32>, vector<32x8xf32>, vector<16x8xf32> -> vector<16x8xf32>
    %c0_106 = arith.constant 0 : index
    %c2_107 = arith.constant 2 : index
    %c0_108 = arith.constant 0 : index
    %c0_109 = arith.constant 0 : index
    %110 = vector.load %arg9[%c0_106, %c2_107, %c0_108, %c0_109] : memref<1x4x1x8xf32, #tpu.memory_space<vmem>>, vector<1x1x1x8xf32>
    %111 = vector.shape_cast %110 : vector<1x1x1x8xf32> to vector<1x8xf32>
    %112 = vector.broadcast %111 : vector<1x8xf32> to vector<16x8xf32>
    %113 = arith.addf %109, %112 : vector<16x8xf32>
    %114 = vector.shape_cast %113 : vector<16x8xf32> to vector<2x8x8xf32>
    %c0_110 = arith.constant 0 : index
    %c2_111 = arith.constant 2 : index
    %c0_112 = arith.constant 0 : index
    %c0_113 = arith.constant 0 : index
    %115 = vector.load %arg10[%c0_110, %c2_111, %c0_112, %c0_113] : memref<1x4x32x8xf32, #tpu.memory_space<vmem>>, vector<1x1x32x8xf32>
    %116 = vector.shape_cast %115 : vector<1x1x32x8xf32> to vector<32x8xf32>
    %cst_114 = arith.constant dense<0.000000e+00> : vector<16x8xf32>
    %117 = tpu.matmul %14, %116, %cst_114 {dimension_numbers = #tpu.dot_dimension_numbers<[1], [0], [0], [1], [0, 0, 1, 1], [], []>} : vector<16x32xf32>, vector<32x8xf32>, vector<16x8xf32> -> vector<16x8xf32>
    %c0_115 = arith.constant 0 : index
    %c2_116 = arith.constant 2 : index
    %c0_117 = arith.constant 0 : index
    %c0_118 = arith.constant 0 : index
    %118 = vector.load %arg11[%c0_115, %c2_116, %c0_117, %c0_118] : memref<1x4x1x8xf32, #tpu.memory_space<vmem>>, vector<1x1x1x8xf32>
    %119 = vector.shape_cast %118 : vector<1x1x1x8xf32> to vector<1x8xf32>
    %120 = vector.broadcast %119 : vector<1x8xf32> to vector<16x8xf32>
    %121 = arith.addf %117, %120 : vector<16x8xf32>
    %122 = vector.shape_cast %121 : vector<16x8xf32> to vector<2x8x8xf32>
    "tpu.trace_start"() <{level = 10 : i32, message = "nld,nsd->nls"}> : () -> ()
    %cst_119 = arith.constant dense<0.000000e+00> : vector<2x8x8xf32>
    %123 = tpu.matmul %106, %114, %cst_119 {dimension_numbers = #tpu.dot_dimension_numbers<[2], [2], [1], [1], [0, 0, 0, 1, 1, 1], [0], [0]>} : vector<2x8x8xf32>, vector<2x8x8xf32>, vector<2x8x8xf32> -> vector<2x8x8xf32>
    "tpu.trace_stop"() : () -> ()
    %cst_120 = arith.constant dense<0xFF800000> : vector<2x8xf32>
    %124 = vector.multi_reduction <maximumf>, %123, %cst_120 [2] : vector<2x8x8xf32> to vector<2x8xf32>
    %125 = vector.shape_cast %124 : vector<2x8xf32> to vector<2x8x1xf32>
    %126 = vector.broadcast %125 : vector<2x8x1xf32> to vector<2x8x8xf32>
    %127 = arith.subf %123, %126 : vector<2x8x8xf32>
    %128 = math.exp %127 : vector<2x8x8xf32>
    %cst_121 = arith.constant dense<0.000000e+00> : vector<2x8xf32>
    %129 = vector.multi_reduction <add>, %128, %cst_121 [2] : vector<2x8x8xf32> to vector<2x8xf32>
    %130 = vector.shape_cast %129 : vector<2x8xf32> to vector<2x8x1xf32>
    %131 = vector.broadcast %130 : vector<2x8x1xf32> to vector<2x8x8xf32>
    %132 = arith.divf %128, %131 : vector<2x8x8xf32>
    %133 = arith.addf %92, %132 : vector<2x8x8xf32>
    "tpu.trace_start"() <{level = 10 : i32, message = "nls,nsd->nld"}> : () -> ()
    %cst_122 = arith.constant dense<0.000000e+00> : vector<2x8x8xf32>
    %134 = tpu.matmul %132, %122, %cst_122 {dimension_numbers = #tpu.dot_dimension_numbers<[2], [1], [1], [2], [0, 0, 0, 1, 1, 2], [0], [0]>} : vector<2x8x8xf32>, vector<2x8x8xf32>, vector<2x8x8xf32> -> vector<2x8x8xf32>
    "tpu.trace_stop"() : () -> ()
    %135 = vector.shape_cast %134 : vector<2x8x8xf32> to vector<16x8xf32>
    %c0_123 = arith.constant 0 : index
    %c2_124 = arith.constant 2 : index
    %c0_125 = arith.constant 0 : index
    %c0_126 = arith.constant 0 : index
    %136 = vector.load %arg12[%c0_123, %c2_124, %c0_125, %c0_126] : memref<1x4x8x32xf32, #tpu.memory_space<vmem>>, vector<1x1x8x32xf32>
    %137 = vector.shape_cast %136 : vector<1x1x8x32xf32> to vector<8x32xf32>
    %cst_127 = arith.constant dense<0.000000e+00> : vector<16x32xf32>
    %138 = tpu.matmul %135, %137, %cst_127 {dimension_numbers = #tpu.dot_dimension_numbers<[1], [0], [0], [1], [0, 0, 1, 1], [], []>} : vector<16x8xf32>, vector<8x32xf32>, vector<16x32xf32> -> vector<16x32xf32>
    %139 = arith.addf %98, %138 : vector<16x32xf32>
    %c0_128 = arith.constant 0 : index
    %c3 = arith.constant 3 : index
    %c0_129 = arith.constant 0 : index
    %c0_130 = arith.constant 0 : index
    %140 = vector.load %arg6[%c0_128, %c3, %c0_129, %c0_130] : memref<1x4x32x8xf32, #tpu.memory_space<vmem>>, vector<1x1x32x8xf32>
    %141 = vector.shape_cast %140 : vector<1x1x32x8xf32> to vector<32x8xf32>
    %cst_131 = arith.constant dense<0.000000e+00> : vector<16x8xf32>
    %142 = tpu.matmul %10, %141, %cst_131 {dimension_numbers = #tpu.dot_dimension_numbers<[1], [0], [0], [1], [0, 0, 1, 1], [], []>} : vector<16x32xf32>, vector<32x8xf32>, vector<16x8xf32> -> vector<16x8xf32>
    %c0_132 = arith.constant 0 : index
    %c3_133 = arith.constant 3 : index
    %c0_134 = arith.constant 0 : index
    %c0_135 = arith.constant 0 : index
    %143 = vector.load %arg7[%c0_132, %c3_133, %c0_134, %c0_135] : memref<1x4x1x8xf32, #tpu.memory_space<vmem>>, vector<1x1x1x8xf32>
    %144 = vector.shape_cast %143 : vector<1x1x1x8xf32> to vector<1x8xf32>
    %145 = vector.broadcast %144 : vector<1x8xf32> to vector<16x8xf32>
    %146 = arith.addf %142, %145 : vector<16x8xf32>
    %147 = vector.shape_cast %146 : vector<16x8xf32> to vector<2x8x8xf32>
    %c0_136 = arith.constant 0 : index
    %c3_137 = arith.constant 3 : index
    %c0_138 = arith.constant 0 : index
    %c0_139 = arith.constant 0 : index
    %148 = vector.load %arg8[%c0_136, %c3_137, %c0_138, %c0_139] : memref<1x4x32x8xf32, #tpu.memory_space<vmem>>, vector<1x1x32x8xf32>
    %149 = vector.shape_cast %148 : vector<1x1x32x8xf32> to vector<32x8xf32>
    %cst_140 = arith.constant dense<0.000000e+00> : vector<16x8xf32>
    %150 = tpu.matmul %12, %149, %cst_140 {dimension_numbers = #tpu.dot_dimension_numbers<[1], [0], [0], [1], [0, 0, 1, 1], [], []>} : vector<16x32xf32>, vector<32x8xf32>, vector<16x8xf32> -> vector<16x8xf32>
    %c0_141 = arith.constant 0 : index
    %c3_142 = arith.constant 3 : index
    %c0_143 = arith.constant 0 : index
    %c0_144 = arith.constant 0 : index
    %151 = vector.load %arg9[%c0_141, %c3_142, %c0_143, %c0_144] : memref<1x4x1x8xf32, #tpu.memory_space<vmem>>, vector<1x1x1x8xf32>
    %152 = vector.shape_cast %151 : vector<1x1x1x8xf32> to vector<1x8xf32>
    %153 = vector.broadcast %152 : vector<1x8xf32> to vector<16x8xf32>
    %154 = arith.addf %150, %153 : vector<16x8xf32>
    %155 = vector.shape_cast %154 : vector<16x8xf32> to vector<2x8x8xf32>
    %c0_145 = arith.constant 0 : index
    %c3_146 = arith.constant 3 : index
    %c0_147 = arith.constant 0 : index
    %c0_148 = arith.constant 0 : index
    %156 = vector.load %arg10[%c0_145, %c3_146, %c0_147, %c0_148] : memref<1x4x32x8xf32, #tpu.memory_space<vmem>>, vector<1x1x32x8xf32>
    %157 = vector.shape_cast %156 : vector<1x1x32x8xf32> to vector<32x8xf32>
    %cst_149 = arith.constant dense<0.000000e+00> : vector<16x8xf32>
    %158 = tpu.matmul %14, %157, %cst_149 {dimension_numbers = #tpu.dot_dimension_numbers<[1], [0], [0], [1], [0, 0, 1, 1], [], []>} : vector<16x32xf32>, vector<32x8xf32>, vector<16x8xf32> -> vector<16x8xf32>
    %c0_150 = arith.constant 0 : index
    %c3_151 = arith.constant 3 : index
    %c0_152 = arith.constant 0 : index
    %c0_153 = arith.constant 0 : index
    %159 = vector.load %arg11[%c0_150, %c3_151, %c0_152, %c0_153] : memref<1x4x1x8xf32, #tpu.memory_space<vmem>>, vector<1x1x1x8xf32>
    %160 = vector.shape_cast %159 : vector<1x1x1x8xf32> to vector<1x8xf32>
    %161 = vector.broadcast %160 : vector<1x8xf32> to vector<16x8xf32>
    %162 = arith.addf %158, %161 : vector<16x8xf32>
    %163 = vector.shape_cast %162 : vector<16x8xf32> to vector<2x8x8xf32>
    "tpu.trace_start"() <{level = 10 : i32, message = "nld,nsd->nls"}> : () -> ()
    %cst_154 = arith.constant dense<0.000000e+00> : vector<2x8x8xf32>
    %164 = tpu.matmul %147, %155, %cst_154 {dimension_numbers = #tpu.dot_dimension_numbers<[2], [2], [1], [1], [0, 0, 0, 1, 1, 1], [0], [0]>} : vector<2x8x8xf32>, vector<2x8x8xf32>, vector<2x8x8xf32> -> vector<2x8x8xf32>
    "tpu.trace_stop"() : () -> ()
    %cst_155 = arith.constant dense<0xFF800000> : vector<2x8xf32>
    %165 = vector.multi_reduction <maximumf>, %164, %cst_155 [2] : vector<2x8x8xf32> to vector<2x8xf32>
    %166 = vector.shape_cast %165 : vector<2x8xf32> to vector<2x8x1xf32>
    %167 = vector.broadcast %166 : vector<2x8x1xf32> to vector<2x8x8xf32>
    %168 = arith.subf %164, %167 : vector<2x8x8xf32>
    %169 = math.exp %168 : vector<2x8x8xf32>
    %cst_156 = arith.constant dense<0.000000e+00> : vector<2x8xf32>
    %170 = vector.multi_reduction <add>, %169, %cst_156 [2] : vector<2x8x8xf32> to vector<2x8xf32>
    %171 = vector.shape_cast %170 : vector<2x8xf32> to vector<2x8x1xf32>
    %172 = vector.broadcast %171 : vector<2x8x1xf32> to vector<2x8x8xf32>
    %173 = arith.divf %169, %172 : vector<2x8x8xf32>
    %174 = arith.addf %133, %173 : vector<2x8x8xf32>
    "tpu.trace_start"() <{level = 10 : i32, message = "nls,nsd->nld"}> : () -> ()
    %cst_157 = arith.constant dense<0.000000e+00> : vector<2x8x8xf32>
    %175 = tpu.matmul %173, %163, %cst_157 {dimension_numbers = #tpu.dot_dimension_numbers<[2], [1], [1], [2], [0, 0, 0, 1, 1, 2], [0], [0]>} : vector<2x8x8xf32>, vector<2x8x8xf32>, vector<2x8x8xf32> -> vector<2x8x8xf32>
    "tpu.trace_stop"() : () -> ()
    %176 = vector.shape_cast %175 : vector<2x8x8xf32> to vector<16x8xf32>
    %c0_158 = arith.constant 0 : index
    %c3_159 = arith.constant 3 : index
    %c0_160 = arith.constant 0 : index
    %c0_161 = arith.constant 0 : index
    %177 = vector.load %arg12[%c0_158, %c3_159, %c0_160, %c0_161] : memref<1x4x8x32xf32, #tpu.memory_space<vmem>>, vector<1x1x8x32xf32>
    %178 = vector.shape_cast %177 : vector<1x1x8x32xf32> to vector<8x32xf32>
    %cst_162 = arith.constant dense<0.000000e+00> : vector<16x32xf32>
    %179 = tpu.matmul %176, %178, %cst_162 {dimension_numbers = #tpu.dot_dimension_numbers<[1], [0], [0], [1], [0, 0, 1, 1], [], []>} : vector<16x8xf32>, vector<8x32xf32>, vector<16x32xf32> -> vector<16x32xf32>
    %180 = arith.addf %139, %179 : vector<16x32xf32>
    %cst_163 = arith.constant 2.500000e-01 : f32
    %181 = vector.broadcast %cst_163 : f32 to vector<2x8x8xf32>
    %182 = arith.mulf %174, %181 : vector<2x8x8xf32>
    %c0_164 = arith.constant 0 : index
    %c0_165 = arith.constant 0 : index
    %c0_166 = arith.constant 0 : index
    %183 = vector.load %arg23[%c0_164, %c0_165, %c0_166] : memref<2x8x8xf32, #tpu.memory_space<vmem>>, vector<2x8x8xf32>
    tpu.vector_store %arg23[%c0_164, %c0_165, %c0_166], %182 {strides = array<i32>} : memref<2x8x8xf32, #tpu.memory_space<vmem>>, vector<2x8x8xf32>,
    %c0_167 = arith.constant 0 : index
    %c0_168 = arith.constant 0 : index
    %c0_169 = arith.constant 0 : index
    %184 = vector.load %arg13[%c0_167, %c0_168, %c0_169] : memref<1x1x32xf32, #tpu.memory_space<vmem>>, vector<1x1x32xf32>
    %185 = vector.shape_cast %184 : vector<1x1x32xf32> to vector<1x32xf32>
    %186 = vector.broadcast %185 : vector<1x32xf32> to vector<16x32xf32>
    %187 = arith.addf %180, %186 : vector<16x32xf32>
    %188 = arith.addf %10, %187 : vector<16x32xf32>
    %cst_170 = arith.constant dense<0.000000e+00> : vector<16xf32>
    %189 = vector.multi_reduction <add>, %188, %cst_170 [1] : vector<16x32xf32> to vector<16xf32>
    %190 = vector.shape_cast %189 : vector<16xf32> to vector<16x1xf32>
    %cst_171 = arith.constant 3.200000e+01 : f32
    %191 = vector.broadcast %cst_171 : f32 to vector<16x1xf32>
    %192 = arith.divf %190, %191 : vector<16x1xf32>
    %193 = vector.broadcast %192 : vector<16x1xf32> to vector<16x32xf32>
    %194 = arith.subf %188, %193 : vector<16x32xf32>
    %195 = arith.mulf %194, %194 : vector<16x32xf32>
    %cst_172 = arith.constant dense<0.000000e+00> : vector<16xf32>
    %196 = vector.multi_reduction <add>, %195, %cst_172 [1] : vector<16x32xf32> to vector<16xf32>
    %197 = vector.shape_cast %196 : vector<16xf32> to vector<16x1xf32>
    %cst_173 = arith.constant 3.200000e+01 : f32
    %198 = vector.broadcast %cst_173 : f32 to vector<16x1xf32>
    %199 = arith.divf %197, %198 : vector<16x1xf32>
    %200 = vector.broadcast %192 : vector<16x1xf32> to vector<16x32xf32>
    %201 = arith.subf %188, %200 : vector<16x32xf32>
    %cst_174 = arith.constant 9.99999974E-6 : f32
    %202 = vector.broadcast %cst_174 : f32 to vector<16x1xf32>
    %203 = arith.addf %199, %202 : vector<16x1xf32>
    %204 = math.rsqrt %203 : vector<16x1xf32>
    %205 = vector.broadcast %204 : vector<16x1xf32> to vector<16x32xf32>
    %206 = arith.mulf %201, %205 : vector<16x32xf32>
    %c0_175 = arith.constant 0 : index
    %c0_176 = arith.constant 0 : index
    %c0_177 = arith.constant 0 : index
    %207 = vector.load %arg14[%c0_175, %c0_176, %c0_177] : memref<1x1x32xf32, #tpu.memory_space<vmem>>, vector<1x1x32xf32>
    %208 = vector.shape_cast %207 : vector<1x1x32xf32> to vector<1x32xf32>
    %209 = vector.broadcast %208 : vector<1x32xf32> to vector<16x32xf32>
    %210 = arith.mulf %206, %209 : vector<16x32xf32>
    %c0_178 = arith.constant 0 : index
    %c0_179 = arith.constant 0 : index
    %c0_180 = arith.constant 0 : index
    %211 = vector.load %arg15[%c0_178, %c0_179, %c0_180] : memref<1x1x32xf32, #tpu.memory_space<vmem>>, vector<1x1x32xf32>
    %212 = vector.shape_cast %211 : vector<1x1x32xf32> to vector<1x32xf32>
    %213 = vector.broadcast %212 : vector<1x32xf32> to vector<16x32xf32>
    %214 = arith.addf %210, %213 : vector<16x32xf32>
    %c0_181 = arith.constant 0 : index
    %c0_182 = arith.constant 0 : index
    %c0_183 = arith.constant 0 : index
    %215 = vector.load %arg16[%c0_181, %c0_182, %c0_183] : memref<1x32x64xf32, #tpu.memory_space<vmem>>, vector<1x32x64xf32>
    %216 = vector.shape_cast %215 : vector<1x32x64xf32> to vector<32x64xf32>
    %cst_184 = arith.constant dense<0.000000e+00> : vector<16x64xf32>
    %217 = tpu.matmul %214, %216, %cst_184 {dimension_numbers = #tpu.dot_dimension_numbers<[1], [0], [0], [1], [0, 0, 1, 1], [], []>} : vector<16x32xf32>, vector<32x64xf32>, vector<16x64xf32> -> vector<16x64xf32>
    %c0_185 = arith.constant 0 : index
    %c0_186 = arith.constant 0 : index
    %c0_187 = arith.constant 0 : index
    %218 = vector.load %arg17[%c0_185, %c0_186, %c0_187] : memref<1x1x64xf32, #tpu.memory_space<vmem>>, vector<1x1x64xf32>
    %219 = vector.shape_cast %218 : vector<1x1x64xf32> to vector<1x64xf32>
    %220 = vector.broadcast %219 : vector<1x64xf32> to vector<16x64xf32>
    %221 = arith.addf %217, %220 : vector<16x64xf32>
    %cst_188 = arith.constant 0.000000e+00 : f32
    %222 = vector.broadcast %cst_188 : f32 to vector<16x64xf32>
    %223 = arith.maximumf %221, %222 : vector<16x64xf32>
    %c0_189 = arith.constant 0 : index
    %c0_190 = arith.constant 0 : index
    %c0_191 = arith.constant 0 : index
    %224 = vector.load %arg18[%c0_189, %c0_190, %c0_191] : memref<1x64x32xf32, #tpu.memory_space<vmem>>, vector<1x64x32xf32>
    %225 = vector.shape_cast %224 : vector<1x64x32xf32> to vector<64x32xf32>
    %cst_192 = arith.constant dense<0.000000e+00> : vector<16x32xf32>
    %226 = tpu.matmul %223, %225, %cst_192 {dimension_numbers = #tpu.dot_dimension_numbers<[1], [0], [0], [1], [0, 0, 1, 1], [], []>} : vector<16x64xf32>, vector<64x32xf32>, vector<16x32xf32> -> vector<16x32xf32>
    %c0_193 = arith.constant 0 : index
    %c0_194 = arith.constant 0 : index
    %c0_195 = arith.constant 0 : index
    %227 = vector.load %arg19[%c0_193, %c0_194, %c0_195] : memref<1x1x32xf32, #tpu.memory_space<vmem>>, vector<1x1x32xf32>
    %228 = vector.shape_cast %227 : vector<1x1x32xf32> to vector<1x32xf32>
    %229 = vector.broadcast %228 : vector<1x32xf32> to vector<16x32xf32>
    %230 = arith.addf %226, %229 : vector<16x32xf32>
    %231 = arith.addf %214, %230 : vector<16x32xf32>
    %cst_196 = arith.constant dense<0.000000e+00> : vector<16xf32>
    %232 = vector.multi_reduction <add>, %231, %cst_196 [1] : vector<16x32xf32> to vector<16xf32>
    %233 = vector.shape_cast %232 : vector<16xf32> to vector<16x1xf32>
    %cst_197 = arith.constant 3.200000e+01 : f32
    %234 = vector.broadcast %cst_197 : f32 to vector<16x1xf32>
    %235 = arith.divf %233, %234 : vector<16x1xf32>
    %236 = vector.broadcast %235 : vector<16x1xf32> to vector<16x32xf32>
    %237 = arith.subf %231, %236 : vector<16x32xf32>
    %238 = arith.mulf %237, %237 : vector<16x32xf32>
    %cst_198 = arith.constant dense<0.000000e+00> : vector<16xf32>
    %239 = vector.multi_reduction <add>, %238, %cst_198 [1] : vector<16x32xf32> to vector<16xf32>
    %240 = vector.shape_cast %239 : vector<16xf32> to vector<16x1xf32>
    %cst_199 = arith.constant 3.200000e+01 : f32
    %241 = vector.broadcast %cst_199 : f32 to vector<16x1xf32>
    %242 = arith.divf %240, %241 : vector<16x1xf32>
    %243 = vector.broadcast %235 : vector<16x1xf32> to vector<16x32xf32>
    %244 = arith.subf %231, %243 : vector<16x32xf32>
    %cst_200 = arith.constant 9.99999974E-6 : f32
    %245 = vector.broadcast %cst_200 : f32 to vector<16x1xf32>
    %246 = arith.addf %242, %245 : vector<16x1xf32>
    %247 = math.rsqrt %246 : vector<16x1xf32>
    %248 = vector.broadcast %247 : vector<16x1xf32> to vector<16x32xf32>
    %249 = arith.mulf %244, %248 : vector<16x32xf32>
    %c0_201 = arith.constant 0 : index
    %c0_202 = arith.constant 0 : index
    %c0_203 = arith.constant 0 : index
    %250 = vector.load %arg20[%c0_201, %c0_202, %c0_203] : memref<1x1x32xf32, #tpu.memory_space<vmem>>, vector<1x1x32xf32>
    %251 = vector.shape_cast %250 : vector<1x1x32xf32> to vector<1x32xf32>
    %252 = vector.broadcast %251 : vector<1x32xf32> to vector<16x32xf32>
    %253 = arith.mulf %249, %252 : vector<16x32xf32>
    %c0_204 = arith.constant 0 : index
    %c0_205 = arith.constant 0 : index
    %c0_206 = arith.constant 0 : index
    %254 = vector.load %arg21[%c0_204, %c0_205, %c0_206] : memref<1x1x32xf32, #tpu.memory_space<vmem>>, vector<1x1x32xf32>
    %255 = vector.shape_cast %254 : vector<1x1x32xf32> to vector<1x32xf32>
    %256 = vector.broadcast %255 : vector<1x32xf32> to vector<16x32xf32>
    %257 = arith.addf %253, %256 : vector<16x32xf32>
    %258 = vector.shape_cast %257 : vector<16x32xf32> to vector<2x8x32xf32>
    %c0_207 = arith.constant 0 : index
    %c0_208 = arith.constant 0 : index
    %c0_209 = arith.constant 0 : index
    %259 = vector.load %arg22[%c0_207, %c0_208, %c0_209] : memref<2x8x32xf32, #tpu.memory_space<vmem>>, vector<2x8x32xf32>
    tpu.vector_store %arg22[%c0_207, %c0_208, %c0_209], %258 {strides = array<i32>} : memref<2x8x32xf32, #tpu.memory_space<vmem>>, vector<2x8x32xf32>,
    return
  }
  func.func @transform_0(%arg0: i32) -> (i32, i32, i32) {
    %c0_i32 = arith.constant 0 : i32
    %c0_i32_0 = arith.constant 0 : i32
    %c0_i32_1 = arith.constant 0 : i32
    %c0_i32_2 = arith.constant 0 : i32
    return %c0_i32, %c0_i32_0, %c0_i32_1 : i32, i32, i32
  }
  func.func @transform_1(%arg0: i32) -> (i32, i32, i32) {
    %c0_i32 = arith.constant 0 : i32
    %c0_i32_0 = arith.constant 0 : i32
    %c0_i32_1 = arith.constant 0 : i32
    %c0_i32_2 = arith.constant 0 : i32
    return %c0_i32, %c0_i32_0, %c0_i32_1 : i32, i32, i32
  }
  func.func @transform_2(%arg0: i32) -> (i32, i32, i32) {
    %c0_i32 = arith.constant 0 : i32
    %c0_i32_0 = arith.constant 0 : i32
    %c0_i32_1 = arith.constant 0 : i32
    %c0_i32_2 = arith.constant 0 : i32
    return %c0_i32, %c0_i32_0, %c0_i32_1 : i32, i32, i32
  }
  func.func @transform_3(%arg0: i32) -> (i32, i32, i32) {
    %c0_i32 = arith.constant 0 : i32
    %c0_i32_0 = arith.constant 0 : i32
    %c0_i32_1 = arith.constant 0 : i32
    %c0_i32_2 = arith.constant 0 : i32
    return %c0_i32, %c0_i32_0, %c0_i32_1 : i32, i32, i32
  }
  func.func @transform_4(%arg0: i32) -> (i32, i32, i32) {
    %c0_i32 = arith.constant 0 : i32
    %c0_i32_0 = arith.constant 0 : i32
    %c0_i32_1 = arith.constant 0 : i32
    %c0_i32_2 = arith.constant 0 : i32
    return %c0_i32, %c0_i32_0, %c0_i32_1 : i32, i32, i32
  }
  func.func @transform_5(%arg0: i32) -> (i32, i32, i32, i32) {
    %c0_i32 = arith.constant 0 : i32
    %c0_i32_0 = arith.constant 0 : i32
    %c0_i32_1 = arith.constant 0 : i32
    %c0_i32_2 = arith.constant 0 : i32
    return %arg0, %c0_i32, %c0_i32_0, %c0_i32_1 : i32, i32, i32, i32
  }
  func.func @transform_6(%arg0: i32) -> (i32, i32, i32, i32) {
    %c0_i32 = arith.constant 0 : i32
    %c0_i32_0 = arith.constant 0 : i32
    %c0_i32_1 = arith.constant 0 : i32
    %c0_i32_2 = arith.constant 0 : i32
    return %arg0, %c0_i32, %c0_i32_0, %c0_i32_1 : i32, i32, i32, i32
  }
  func.func @transform_7(%arg0: i32) -> (i32, i32, i32, i32) {
    %c0_i32 = arith.constant 0 : i32
    %c0_i32_0 = arith.constant 0 : i32
    %c0_i32_1 = arith.constant 0 : i32
    %c0_i32_2 = arith.constant 0 : i32
    return %arg0, %c0_i32, %c0_i32_0, %c0_i32_1 : i32, i32, i32, i32
  }
  func.func @transform_8(%arg0: i32) -> (i32, i32, i32, i32) {
    %c0_i32 = arith.constant 0 : i32
    %c0_i32_0 = arith.constant 0 : i32
    %c0_i32_1 = arith.constant 0 : i32
    %c0_i32_2 = arith.constant 0 : i32
    return %arg0, %c0_i32, %c0_i32_0, %c0_i32_1 : i32, i32, i32, i32
  }
  func.func @transform_9(%arg0: i32) -> (i32, i32, i32, i32) {
    %c0_i32 = arith.constant 0 : i32
    %c0_i32_0 = arith.constant 0 : i32
    %c0_i32_1 = arith.constant 0 : i32
    %c0_i32_2 = arith.constant 0 : i32
    return %arg0, %c0_i32, %c0_i32_0, %c0_i32_1 : i32, i32, i32, i32
  }
  func.func @transform_10(%arg0: i32) -> (i32, i32, i32, i32) {
    %c0_i32 = arith.constant 0 : i32
    %c0_i32_0 = arith.constant 0 : i32
    %c0_i32_1 = arith.constant 0 : i32
    %c0_i32_2 = arith.constant 0 : i32
    return %arg0, %c0_i32, %c0_i32_0, %c0_i32_1 : i32, i32, i32, i32
  }
  func.func @transform_11(%arg0: i32) -> (i32, i32, i32, i32) {
    %c0_i32 = arith.constant 0 : i32
    %c0_i32_0 = arith.constant 0 : i32
    %c0_i32_1 = arith.constant 0 : i32
    %c0_i32_2 = arith.constant 0 : i32
    return %arg0, %c0_i32, %c0_i32_0, %c0_i32_1 : i32, i32, i32, i32
  }
  func.func @transform_12(%arg0: i32) -> (i32, i32, i32) {
    %c0_i32 = arith.constant 0 : i32
    %c0_i32_0 = arith.constant 0 : i32
    %c0_i32_1 = arith.constant 0 : i32
    return %arg0, %c0_i32, %c0_i32_0 : i32, i32, i32
  }
  func.func @transform_13(%arg0: i32) -> (i32, i32, i32) {
    %c0_i32 = arith.constant 0 : i32
    %c0_i32_0 = arith.constant 0 : i32
    %c0_i32_1 = arith.constant 0 : i32
    return %arg0, %c0_i32, %c0_i32_0 : i32, i32, i32
  }
  func.func @transform_14(%arg0: i32) -> (i32, i32, i32) {
    %c0_i32 = arith.constant 0 : i32
    %c0_i32_0 = arith.constant 0 : i32
    %c0_i32_1 = arith.constant 0 : i32
    return %arg0, %c0_i32, %c0_i32_0 : i32, i32, i32
  }
  func.func @transform_15(%arg0: i32) -> (i32, i32, i32) {
    %c0_i32 = arith.constant 0 : i32
    %c0_i32_0 = arith.constant 0 : i32
    %c0_i32_1 = arith.constant 0 : i32
    return %arg0, %c0_i32, %c0_i32_0 : i32, i32, i32
  }
  func.func @transform_16(%arg0: i32) -> (i32, i32, i32) {
    %c0_i32 = arith.constant 0 : i32
    %c0_i32_0 = arith.constant 0 : i32
    %c0_i32_1 = arith.constant 0 : i32
    return %arg0, %c0_i32, %c0_i32_0 : i32, i32, i32
  }
  func.func @transform_17(%arg0: i32) -> (i32, i32, i32) {
    %c0_i32 = arith.constant 0 : i32
    %c0_i32_0 = arith.constant 0 : i32
    %c0_i32_1 = arith.constant 0 : i32
    return %arg0, %c0_i32, %c0_i32_0 : i32, i32, i32
  }
  func.func @transform_18(%arg0: i32) -> (i32, i32, i32) {
    %c0_i32 = arith.constant 0 : i32
    %c0_i32_0 = arith.constant 0 : i32
    %c0_i32_1 = arith.constant 0 : i32
    return %arg0, %c0_i32, %c0_i32_0 : i32, i32, i32
  }
  func.func @transform_19(%arg0: i32) -> (i32, i32, i32) {
    %c0_i32 = arith.constant 0 : i32
    %c0_i32_0 = arith.constant 0 : i32
    %c0_i32_1 = arith.constant 0 : i32
    return %arg0, %c0_i32, %c0_i32_0 : i32, i32, i32
  }
  func.func @transform_20(%arg0: i32) -> (i32, i32, i32) {
    %c0_i32 = arith.constant 0 : i32
    %c0_i32_0 = arith.constant 0 : i32
    %c0_i32_1 = arith.constant 0 : i32
    return %arg0, %c0_i32, %c0_i32_0 : i32, i32, i32
  }
  func.func @transform_21(%arg0: i32) -> (i32, i32, i32) {
    %c0_i32 = arith.constant 0 : i32
    %c0_i32_0 = arith.constant 0 : i32
    %c0_i32_1 = arith.constant 0 : i32
    %c0_i32_2 = arith.constant 0 : i32
    return %c0_i32, %c0_i32_0, %c0_i32_1 : i32, i32, i32
  }
  func.func @transform_22(%arg0: i32) -> (i32, i32, i32) {
    %c0_i32 = arith.constant 0 : i32
    %c0_i32_0 = arith.constant 0 : i32
    %c0_i32_1 = arith.constant 0 : i32
    %c0_i32_2 = arith.constant 0 : i32
    return %c0_i32, %c0_i32_0, %c0_i32_1 : i32, i32, i32
  }
}

</mosaic_0001>

<bundles_post_ra>
// kernel: basic_transformer_pallas.1
= control target key start
LH: loop header
LB: loop body
LE: loop exit
PB: predicated region body
PF: predicated region fallthrough
CT: control target
= control target key end

     0   :  { %s5409_s0 = inlined_call_operand.vmem [shape: f32[2,8,32], index: 0, kind: input, shape index: {}]   ;;  %s5410_s1 = inlined_call_operand.vmem [shape: f32[2,8,32], index: 1, kind: input, shape index: {}]   ;;  %s5411_s2 = inlined_call_operand.vmem [shape: f32[2,8,32], index: 2, kind: input, shape index: {}]   ;;  %s5412_s3 = inlined_call_operand.vmem [shape: f32[2,8,32], index: 3, kind: input, shape index: {}]   ;;  %s5413_s4 = inlined_call_operand.vmem [shape: f32[2,8,32], index: 4, kind: input, shape index: {}]   ;;  %s5414_s5 = inlined_call_operand.vmem [shape: f32[2,4,32,8], index: 5, kind: input, shape index: {}]   ;;  %s5415_s6 = inlined_call_operand.vmem [shape: f32[2,4,1,8], index: 6, kind: input, shape index: {}]   ;;  %s5416_s7 = inlined_call_operand.vmem [shape: f32[2,4,32,8], index: 7, kind: input, shape index: {}]   ;;  %s5417_s8 = inlined_call_operand.vmem [shape: f32[2,4,1,8], index: 8, kind: input, shape index: {}]   ;;  %s5418_s9 = inlined_call_operand.vmem [shape: f32[2,4,32,8], index: 9, kind: input, shape index: {}]   ;;  %s5419_s10 = inlined_call_operand.vmem [shape: f32[2,4,1,8], index: 10, kind: input, shape index: {}]   ;;  %s5420_s11 = inlined_call_operand.vmem [shape: f32[2,4,8,32], index: 11, kind: input, shape index: {}]   ;;  %s5421_s12 = inlined_call_operand.vmem [shape: f32[2,1,32], index: 12, kind: input, shape index: {}]   ;;  %s5422_s13 = inlined_call_operand.vmem [shape: f32[2,1,32], index: 13, kind: input, shape index: {}]   ;;  %s5423_s14 = inlined_call_operand.vmem [shape: f32[2,1,32], index: 14, kind: input, shape index: {}]   ;;  %s5424_s15 = inlined_call_operand.vmem [shape: f32[2,32,64], index: 15, kind: input, shape index: {}]   ;;  %s5425_s16 = inlined_call_operand.vmem [shape: f32[2,1,64], index: 16, kind: input, shape index: {}]   ;;  %s5426_s17 = inlined_call_operand.vmem [shape: f32[2,64,32], index: 17, kind: input, shape index: {}]   ;;  %s5427_s18 = inlined_call_operand.vmem [shape: f32[2,1,32], index: 18, kind: input, shape index: {}]   ;;  %s5428_s19 = inlined_call_operand.vmem [shape: f32[2,1,32], index: 19, kind: input, shape index: {}]   ;;  %s5429_s20 = inlined_call_operand.vmem [shape: f32[2,1,32], index: 20, kind: input, shape index: {}]   ;;  %s5430_s21 = inlined_call_operand.vmem [shape: f32[2,8,32], index: 21, kind: output, shape index: {0}]   ;;  %s5431_s22 = inlined_call_operand.hbm [shape: f32[2,8,8], index: 22, kind: output, shape index: {1}]  }
   0x1   :  { %5447 = sst [smem:[#allocation12_spill]] %s5409_s0 }
   0x2   :  { %5448 = sst [smem:[#allocation13_spill]] %s5410_s1 }
   0x3   :  { %5449 = sst [smem:[#allocation14_spill]] %s5411_s2 }
   0x4   :  { %5450 = sst [smem:[#allocation15_spill]] %s5412_s3 }
   0x5   :  { %5451 = sst [smem:[#allocation16_spill]] %s5413_s4 }
   0x6   :  { %5452 = sst [smem:[#allocation17_spill]] %s5414_s5 }
   0x7   :  { %5453 = sst [smem:[#allocation18_spill]] %s5415_s6 }
   0x8   :  { %5454 = sst [smem:[#allocation19_spill]] %s5416_s7 }
   0x9   :  { %5455 = sst [smem:[#allocation20_spill]] %s5417_s8 }
   0xa   :  { %5456 = sst [smem:[#allocation21_spill]] %s5418_s9 }
   0xb   :  { %5457 = sst [smem:[#allocation22_spill]] %s5419_s10 }
   0xc   :  { %5458 = sst [smem:[#allocation23_spill]] %s5420_s11 }
   0xd   :  { %5459 = sst [smem:[#allocation24_spill]] %s5430_s21 }
   0xe   :  { %5460 = sst [smem:[#allocation25_spill]] %s5431_s22 }
   0xf   :  { %28 = vsyncpa [#allocation5], 0  ;;  %s4923_s3 = smov 0  }
  0x10 LB: > { %5461 = sst [smem:[#allocation7_spill]] %s4801_s3  ;;  %s4929_s28 = sadd.s32 4294967295, %s4801_s3   ;;  %s4801_s3 = sphi %s4923_s3, %s34_s3  }
  0x11   : > { %5462 = sst [smem:[#allocation8_spill]] %s4929_s28  ;;  %p4160_p0 = scmp.ge.s32.totalorder %s4801_s3, 1 }
  0x12   : > { %p739_p1 = scmp.lt.s32.totalorder %s4801_s3, 3 }
  0x14   : > { %p740_p2 = pnand %p4160_p0, %p739_p1 }
  0x16   : > { %743 = sbr.rel (%p740_p2) target bundleno = 4731 (0x127b), region = 104 }
  0x1b   : > { %p854_p3 = scmp.lt.s32.totalorder %s4929_s28, 1  ;;  %s5463_s1 = sld [smem:[#allocation17_spill]] }
  0x1c   : > { %s5465_s25 = sld [smem:[#allocation18_spill]] }
  0x1d   : > { %s4935_s29 = scalar_select %p854_p3, %s4929_s28, 1 }
  0x1e   : > { %s5467_s7 = sld [smem:[#allocation19_spill]] }
  0x1f   : > { %s4308_s30 = sshll.u32 %s4935_s29, 7  ;;  %s4163_s4 = sshll.u32 %s4935_s29, 2 }
  0x20   : > { %s5469_s8 = sld [smem:[#allocation20_spill]] }
  0x21   : > { %s4942_s5 = scalar_lea.vmem %s5463_s1, %s4308_s30  ;;  %s5470_s9 = sld [smem:[#allocation21_spill]] }
  0x22   : > { %5464 = sst [smem:[#allocation9_spill]] %s4942_s5  ;;  %s4947_s26 = scalar_lea.vmem %s5465_s25, %s4163_s4 }
  0x23   : > { %5466 = sst [smem:[#allocation10_spill]] %s4947_s26  ;;  %s4311_s26 = sshll.u32 %s4935_s29, 5 }
  0x24   : > { %s4952_s3 = scalar_lea.vmem %s5467_s7, %s4308_s30  ;;  %s5471_s10 = sld [smem:[#allocation22_spill]] }
  0x25   : > { %5468 = sst [smem:[#allocation11_spill]] %s4952_s3  ;;  %s4313_s3 = sshll.u32 %s4935_s29, 6 }
  0x26   : > { %s4957_s28 = scalar_lea.vmem %s5469_s8, %s4163_s4  ;;  %s5472_s11 = sld [smem:[#allocation23_spill]] }
  0x27   : > { %s4962_s1 = scalar_lea.vmem %s5470_s9, %s4308_s30  ;;  %s4990_s9 = scalar_lea.vmem %s5424_s15, %s4311_s26 }
  0x28   : > { %s5473_s2 = sld [smem:[#allocation8_spill]] }
  0x2a   : > { %s4967_s25 = scalar_lea.vmem %s5471_s10, %s4163_s4 }
  0x2c   : > { %s4977_s21 = scalar_lea.vmem %s5472_s11, %s4311_s26  ;;  %s5000_s11 = scalar_lea.vmem %s5426_s17, %s4313_s3 }
  0x2e   : > { %p4176_p4 = scmp.ne.s32.totalorder %s5473_s2, 0 }
  0x2f   : > { %s5474_s10 = sld [smem:[#allocation12_spill]] (!%p4176_p4) }
  0x30   : > { %920 = sbr.rel (%p4176_p4) target bundleno = 58 (0x3a), region = 108  ;;  %s5475_s24 = sld [smem:[#allocation13_spill]] (!%p4176_p4) }
  0x31   : > { %s5476_s26 = sld [smem:[#allocation24_spill]] (!%p4176_p4) }
  0x32   : > { %s5477_s5 = sld [smem:[#allocation14_spill]] (!%p4176_p4) }
  0x35   : > { %v921_v0 = vld [vmem:[%s5474_s10] sm:$0xff]  ;;  %vm923_vm0 = vcmask 261120   ;;  %v922_v1 = vld [vmem:[%s5474_s10 + $0x8] sm:$0xff] }
  0x36   : > { %v926_v2 = vld [vmem:[%s5475_s24] sm:$0xff]  ;;  %v927_v3 = vld [vmem:[%s5475_s24 + $0x8] sm:$0xff] }
  0x37   : > { %924 = vst.msk [vmem:[%s5476_s26] sm:$0xff] %vm923_vm0, %v921_v0  ;;  %925 = vst.msk [vmem:[%s5476_s26 + $0x8] sm:$0xff] %vm923_vm0, %v922_v1 }
  0x38   : > { %928 = vst.msk [vmem:[#allocation2] sm:$0xff] %vm923_vm0, %v926_v2  ;;  %v930_v4 = vld [vmem:[%s5477_s5] sm:$0xff]  ;;  %v931_v5 = vld [vmem:[%s5477_s5 + $0x8] sm:$0xff]  ;;  %929 = vst.msk [vmem:[#allocation2 + $0x8] sm:$0xff] %vm923_vm0, %v927_v3 }
  0x39   : > { %932 = vst.msk [vmem:[#allocation3] sm:$0xff] %vm923_vm0, %v930_v4  ;;  %933 = vst.msk [vmem:[#allocation3 + $0x8] sm:$0xff] %vm923_vm0, %v931_v5 }
  0x3a PF: > { %s5478_s4 = sld [smem:[#allocation11_spill]]  ;;  %vm940_vm1 = vcmask 261120   ;;  %v1140_v26 = vld [vmem:[%s4962_s1 + $0x18] sm:$0xff]  ;;  %v1139_v27 = vld [vmem:[%s4962_s1 + $0x10] sm:$0xff]  ;;  %v1138_v30 = vld [vmem:[%s4962_s1 + $0x8] sm:$0xff]  ;;  %v4803_v32 = vmov 0.0   ;;  %s5486_s5 = scalar_lea.vmem %s5422_s13, %s4935_s29 }
  0x3b   : > { %s5479_s22 = sld [smem:[#allocation9_spill]]  ;;  %v1137_v31 = vld [vmem:[%s4962_s1] sm:$0xff]  ;;  %vm4804_vm2 = vmmov 0   ;;  %vm1229_vm3 = vcmask 64512   ;;  %s5487_s7 = scalar_lea.vmem %s5423_s14, %s4935_s29  ;;  %vm3814_vm4 = vcmask 523264  }
  0x3c   : > { %s5480_s23 = sld [smem:[#allocation15_spill]]  ;;  %v4180_v35 = vld [vmem:[%s4957_s28] ss:$0 sm:$0xff]  ;;  %s5488_s30 = scalar_lea.vmem %s5425_s16, %s4935_s29 }
  0x3d   : > { %s5481_s2 = sld [smem:[#allocation24_spill]]  ;;  %v4183_v45 = vld [vmem:[%s4967_s25] ss:$0 sm:$0xff] }
  0x3e   : > { %s5482_s3 = sld [smem:[#allocation16_spill]] }
  0x3f   : > { %v934_v14 = vld [vmem:[#allocation2] sm:$0xff]  ;;  %v935_v19 = vld [vmem:[#allocation2 + $0x8] sm:$0xff]  ;;  %s5484_s10 = sld [smem:[#allocation10_spill]] }
  0x40   : > { %v1048_v6 = vld [vmem:[%s5478_s4 + $0x18] sm:$0xff]  ;;  %v1047_v8 = vld [vmem:[%s5478_s4 + $0x10] sm:$0xff]  ;;  %v1046_v10 = vld [vmem:[%s5478_s4 + $0x8] sm:$0xff]  ;;  %s5490_s6 = sld [smem:[#allocation8_spill]] }
  0x41   : > { %v956_v7 = vld [vmem:[%s5479_s22 + $0x18] sm:$0xff]  ;;  %4457 = vmatprep.subr.mxu1 %v1048_v6  ;;  %v955_v9 = vld [vmem:[%s5479_s22 + $0x10] sm:$0xff]  ;;  %v954_v11 = vld [vmem:[%s5479_s22 + $0x8] sm:$0xff] }
  0x42   : > { %4446 = vmatprep.subr.mxu0 %v956_v7  ;;  %4458 = vmatpush3.msra.mxu1 %v1048_v6  ;;  %v1045_v12 = vld [vmem:[%s5478_s4] sm:$0xff]  ;;  %v937_v20 = vld [vmem:[%s5480_s23 + $0x8] sm:$0xff]  ;;  %v5088_v33 = vld [vmem:[#allocation3] sm:$0xff] }
  0x43   : > { %4447 = vmatpush3.msra.mxu0 %v956_v7  ;;  %v953_v13 = vld [vmem:[%s5479_s22] sm:$0xff]  ;;  %4459 = vmatprep.subr.mxu1 %v1047_v8  ;;  %v944_v21 = vld [vmem:[%s5481_s2 + $0x8] sm:$0xff]  ;;  %v939_v23 = vadd.f32 %v937_v20, %v935_v19  ;;  %v5092_v34 = vld [vmem:[#allocation3 + $0x8] sm:$0xff] }
  0x44   : > { %4448 = vmatprep.subr.mxu0 %v955_v9  ;;  %v936_v15 = vld [vmem:[%s5480_s23] sm:$0xff]  ;;  %s5483_s8 = smov %s5482_s3  ;;  %4460 = vmatpush3.msra.mxu1 %v1047_v8  ;;  %v4203_v2 = vld [vmem:[%s5478_s4 + $0x38] sm:$0xff]  ;;  %v4202_v8 = vld [vmem:[%s5478_s4 + $0x30] sm:$0xff] }
  0x45   : > { %v943_v16 = vld [vmem:[%s5481_s2] sm:$0xff]  ;;  %4449 = vmatpush3.msra.mxu0 %v955_v9  ;;  %v938_v18 = vadd.f32 %v936_v15, %v934_v14  ;;  %4461 = vmatprep.subr.mxu1 %v1046_v10  ;;  %v946_v24 = vld [vmem:[%s5483_s8 + $0x8] sm:$0xff]  ;;  %942 = vst.msk [vmem:[#allocation2 + $0x8] sm:$0xff] %vm940_vm1, %v939_v23  ;;  %v4195_v3 = vld [vmem:[%s5479_s22 + $0x38] sm:$0xff] }
  0x46   : > { %v945_v17 = vld [vmem:[%s5482_s3] sm:$0xff]  ;;  %4450 = vmatprep.subr.mxu0 %v954_v11  ;;  %4462 = vmatpush3.msra.mxu1 %v1046_v10  ;;  %v5068_v25 = vadd.f32 %v946_v24, %v944_v21  ;;  %v4201_v10 = vld [vmem:[%s5478_s4 + $0x28] sm:$0xff]  ;;  %p4712_p5 = scmp.eq.s32.totalorder %s5490_s6, 1 }
  0x47   : > { %v5062_v22 = vadd.f32 %v945_v17, %v943_v16  ;;  %4451 = vmatpush3.msra.mxu0 %v954_v11  ;;  %941 = vst.msk [vmem:[#allocation2] sm:$0xff] %vm940_vm1, %v938_v18  ;;  %4463 = vmatprep.subr.mxu1 %v1045_v12  ;;  %v4177_v37 = vld [vmem:[%s5484_s10] ss:$0 sm:$0xff]  ;;  %v4193_v14 = vld [vmem:[%s5479_s22 + $0x28] sm:$0xff]  ;;  %v4205_v21 = vld [vmem:[%s4957_s28 + $0x1] ss:$0 sm:$0xff] }
  0x48   : > { %4452 = vmatprep.subr.mxu0 %v953_v13  ;;  %4464 = vmatpush3.msra.mxu1 %v1045_v12  ;;  %v4194_v12 = vld [vmem:[%s5479_s22 + $0x30] sm:$0xff]  ;;  %v4192_v15 = vld [vmem:[%s5479_s22 + $0x20] sm:$0xff] }
  0x49   : > { %4453 = vmatpush3.msra.mxu0 %v953_v13  ;;  %4454 = vmatprep.mubr.msk.f32.mxu0 %vm940_vm1, %v5062_v22  ;;  %v4200_v13 = vld [vmem:[%s5478_s4 + $0x20] sm:$0xff] }
  0x4a   : > { %4468 = vmatprep.subr.mxu0 %v1140_v26  ;;  %4455 = vmatmul.mubr.msk.f32.vlgmr.msra.gmra.mxu0 %vm940_vm1, %v5068_v25 }
  0x4b   : > { %4469 = vmatpush3.msra.mxu0 %v1140_v26  ;;  %4484 = vmatprep.subr.mxu1 %v4803_v32 }
  0x4c   : > { %4470 = vmatprep.subr.mxu0 %v1139_v27  ;;  %v5081_v29 = vld [vmem:[#allocation2 + $0x8] sm:$0xff]  ;;  %4476 = vmatprep.mubr.msk.f32.mxu0 %vm940_vm1, %v5088_v33 }
  0x4d   : > { %4471 = vmatpush3.msra.mxu0 %v1139_v27  ;;  %v4197_v27 = vld [vmem:[%s5484_s10 + $0x1] ss:$0 sm:$0xff] }
  0x4e   : > { %v5077_v28 = vld [vmem:[#allocation2] sm:$0xff]  ;;  %4472 = vmatprep.subr.mxu0 %v1138_v30 }
  0x4f   : > { %4465 = vmatprep.mubr.msk.f32.mxu1 %vm940_vm1, %v5077_v28  ;;  %4473 = vmatpush3.msra.mxu0 %v1138_v30 }
  0x50   : > { %4466 = vmatmul.mubr.msk.f32.vlgmr.msra.gmra.mxu1 %vm940_vm1, %v5081_v29  ;;  %4474 = vmatprep.subr.mxu0 %v1137_v31 }
  0x51   : > { %4475 = vmatpush3.msra.mxu0 %v1137_v31  ;;  %4486 = vmatprep.mubr.msk.f32.mxu1 %vm4804_vm2, %v4803_v32 }
  0x52   : > { %4477 = vmatmul.mubr.msk.f32.vlgmr.msra.gmra.mxu0 %vm940_vm1, %v5092_v34  ;;  %4479 = vmatprep.subr.mxu0 %v4803_v32 }
  0x53   : > { %4481 = vmatprep.mubr.msk.f32.mxu0 %vm4804_vm2, %v4803_v32 }
 0x10a   : > { %v4456_v36 = vpop.f32.mrf.mxu0 }
 0x10b   : > { %v1042_v40 = vadd.f32 %v4456_v36, %v4177_v37 }
 0x10c   : > { %v1036_v43 = vpop.f32.mrf.mxu0 }
 0x10d   : > { %v1037_v44 = vadd.f32 %v4177_v37, %v1036_v43  ;;  %v4211_v37 = vld [vmem:[%s4962_s1 + $0x38] sm:$0xff] }
 0x110   : > { %v4467_v38 = vpop.f32.mrf.mxu1 }
 0x111   : > { %v1134_v39 = vadd.f32 %v4467_v38, %v4180_v35  ;;  %v4210_v38 = vld [vmem:[%s4962_s1 + $0x30] sm:$0xff] }
 0x112   : > { %v1128_v41 = vpop.f32.mrf.mxu1  ;;  %v4478_v46 = vpop.f32.mrf.mxu0 }
 0x113   : > { %v1129_v42 = vadd.f32 %v4180_v35, %v1128_v41  ;;  %4485 = vmatpush3.xpose.msk.msra.mxu1 %vm1229_vm3, %v1134_v39  ;;  %v1226_v47 = vadd.f32 %v4478_v46, %v4183_v45  ;;  %v4209_v39 = vld [vmem:[%s4962_s1 + $0x28] sm:$0xff] }
 0x114   : > { %4494 = vmatprep.subr.mxu1 %v4803_v32  ;;  %v1220_v48 = vpop.f32.mrf.mxu0 }
 0x115   : > { %4480 = vmatpush3.xpose.msk.msra.mxu0 %vm1229_vm3, %v1129_v42  ;;  %v1221_v49 = vadd.f32 %v4183_v45, %v1220_v48 }
 0x116   : > { %4487 = vmatmul.mubr.msk.f32.vlgmr.msra.gmra.mxu1 %vm1229_vm3, %v1042_v40  ;;  %4489 = vmatprep.subr.mxu0 %v4803_v32  ;;  %v4208_v40 = vld [vmem:[%s4962_s1 + $0x20] sm:$0xff] }
 0x117   : > { %4496 = vmatprep.mubr.msk.f32.mxu1 %vm4804_vm2, %v4803_v32  ;;  %4495 = vmatpush3.msra.mxu1 %v1226_v47 }
 0x118   : > { %4482 = vmatmul.mubr.msk.f32.vlgmr.msra.gmra.mxu0 %vm1229_vm3, %v1037_v44  ;;  %4510 = vmatprep.subr.mxu1 %v4203_v2 }
 0x119   : > { %4491 = vmatprep.mubr.msk.f32.mxu0 %vm4804_vm2, %v4803_v32  ;;  %4490 = vmatpush3.msra.mxu0 %v1221_v49 }
 0x11a   : > { %4499 = vmatprep.subr.mxu0 %v4195_v3 }
 0x1d6   : > { %v1378_v50 = vpop.f32.mrf.mxu1 }
 0x1d7   : > { %v1385_v51 = vsel %vm1229_vm3, %v1378_v50, -inf }
 0x1d8   : > { %1386 = vmax.xlane.f32.xlu0 %v1385_v51  ;;  %v1302_v52 = vpop.f32.mrf.mxu0  ;;  %v4488_v53 = vpop.f32.mrf.mxu1 }
 0x1d9   : > { %v1382_v55 = vsel %vm1229_vm3, %v1302_v52, -inf }
 0x1da   : > { %v4483_v54 = vpop.f32.mrf.mxu0 }
 0x1dc   : > { %1383 = vmax.xlane.f32.xlu0 %v1382_v55 }
 0x261   : > { %v1387_v56 = vpop.xlane.xlu0 %1386 }
 0x262   : > { %v1389_v57 = vsub.f32 %v1378_v50, %v1387_v56 }
 0x264   : > { %v1392_v58 = vmul.f32 1.442695, %v1389_v57 }
 0x265   : > { %v1384_v59 = vpop.xlane.xlu0 %1383 }
 0x266   : > { %4727 = vpow2.f32 %v1392_v58  ;;  %v1388_v60 = vsub.f32 %v1302_v52, %v1384_v59  ;;  %v4213_v58 = vld [vmem:[%s4967_s25 + $0x1] ss:$0 sm:$0xff] }
 0x268   : > { %v1390_v61 = vmul.f32 1.442695, %v1388_v60 }
 0x26a   : > { %4729 = vpow2.f32 %v1390_v61 }
 0x273   : > { %v4728_v62 = vpop.eup %4727 }
 0x274   : > { %v1397_v63 = vsel %vm1229_vm3, %v4728_v62, 0.0 }
 0x275   : > { %1398 = vadd.xlane.f32.xlu1 %v1397_v63 }
 0x277   : > { %v4730_v0 = vpop.eup %4729 }
 0x278   : > { %v1394_v1 = vsel %vm1229_vm3, %v4730_v0, 0.0 }
 0x279   : > { %1395 = vadd.xlane.f32.xlu1 %v1394_v1 }
 0x2fe   : > { %v1399_v4 = vpop.xlane.xlu1 %1398 }
 0x2ff   : > { %4731 = vrcp.f32 %v1399_v4 }
 0x302   : > { %v1396_v5 = vpop.xlane.xlu1 %1395 }
 0x303   : > { %4733 = vrcp.f32 %v1396_v5  ;;  %v4238_v5 = vld [vmem:[%s5478_s4 + $0x58] sm:$0xff] }
 0x30c   : > { %v4732_v6 = vpop.eup %4731 }
 0x30d   : > { %v5120_v7 = vmul.f32 %v4732_v6, %v4728_v62  ;;  %v1552_v62 = vld [vmem:[%s4977_s21] sm:$0xff]  ;;  %v4222_v6 = vld [vmem:[%s4977_s21 + $0x8] sm:$0xff] }
 0x30f   : > { %4497 = vmatmul.mubr.msk.f32.vlgmr.msra.gmra.mxu1 %vm1229_vm3, %v5120_v7 }
 0x310   : > { %v4734_v9 = vpop.eup %4733  ;;  %4511 = vmatpush3.msra.mxu1 %v4203_v2  ;;  %4518 = vmatprep.mubr.msk.f32.mxu1 %vm940_vm1, %v5077_v28 }
 0x311   : > { %4512 = vmatprep.subr.mxu1 %v4202_v8  ;;  %v5128_v11 = vmul.f32 %v4734_v9, %v4730_v0  ;;  %v4236_v9 = vld [vmem:[%s5478_s4 + $0x48] sm:$0xff] }
 0x312   : > { %4513 = vmatpush3.msra.mxu1 %v4202_v8  ;;  %v4237_v8 = vld [vmem:[%s5478_s4 + $0x50] sm:$0xff] }
 0x313   : > { %4514 = vmatprep.subr.mxu1 %v4201_v10  ;;  %4492 = vmatmul.mubr.msk.f32.vlgmr.msra.gmra.mxu0 %vm1229_vm3, %v5128_v11 }
 0x314   : > { %4500 = vmatpush3.msra.mxu0 %v4195_v3  ;;  %4515 = vmatpush3.msra.mxu1 %v4201_v10  ;;  %v4230_v10 = vld [vmem:[%s5479_s22 + $0x58] sm:$0xff] }
 0x315   : > { %4501 = vmatprep.subr.mxu0 %v4194_v12  ;;  %4516 = vmatprep.subr.mxu1 %v4200_v13 }
 0x316   : > { %4502 = vmatpush3.msra.mxu0 %v4194_v12  ;;  %4517 = vmatpush3.msra.mxu1 %v4200_v13  ;;  %v4235_v12 = vld [vmem:[%s5478_s4 + $0x40] sm:$0xff] }
 0x317   : > { %4503 = vmatprep.subr.mxu0 %v4193_v14  ;;  %4519 = vmatmul.mubr.msk.f32.vlgmr.msra.gmra.mxu1 %vm940_vm1, %v5081_v29 }
 0x318   : > { %4504 = vmatpush3.msra.mxu0 %v4193_v14  ;;  %4507 = vmatprep.mubr.msk.f32.mxu0 %vm940_vm1, %v5062_v22 }
 0x319   : > { %4505 = vmatprep.subr.mxu0 %v4192_v15  ;;  %4532 = vmatprep.subr.mxu1 %v4803_v32 }
 0x31a   : > { %4506 = vmatpush3.msra.mxu0 %v4192_v15  ;;  %4534 = vmatprep.mubr.msk.f32.mxu1 %vm4804_vm2, %v4803_v32 }
 0x31b   : > { %4508 = vmatmul.mubr.msk.f32.vlgmr.msra.gmra.mxu0 %vm940_vm1, %v5068_v25  ;;  %4521 = vmatprep.subr.mxu0 %v4211_v37 }
 0x31c   : > { %4529 = vmatprep.mubr.msk.f32.mxu0 %vm940_vm1, %v5088_v33  ;;  %4522 = vmatpush3.msra.mxu0 %v4211_v37  ;;  %v4232_v37 = vld [vmem:[%s5484_s10 + $0x2] ss:$0 sm:$0xff] }
 0x31d   : > { %4523 = vmatprep.subr.mxu0 %v4210_v38 }
 0x31e   : > { %4524 = vmatpush3.msra.mxu0 %v4210_v38 }
 0x31f   : > { %4525 = vmatprep.subr.mxu0 %v4209_v39 }
 0x320   : > { %4526 = vmatpush3.msra.mxu0 %v4209_v39 }
 0x321   : > { %4527 = vmatprep.subr.mxu0 %v4208_v40 }
 0x322   : > { %4528 = vmatpush3.msra.mxu0 %v4208_v40 }
 0x323   : > { %4530 = vmatmul.mubr.msk.f32.vlgmr.msra.gmra.mxu0 %vm940_vm1, %v5092_v34  ;;  %4542 = vmatprep.subr.mxu0 %v4803_v32 }
 0x324   : > { %4544 = vmatprep.mubr.msk.f32.mxu0 %vm4804_vm2, %v4803_v32 }
 0x3cf   : > { %v5147_v16 = vpop.f32.mrf.mxu1 }
 0x3d1   : > { %v4498_v17 = vpop.f32.mrf.mxu1 }
 0x3d3   : > { %v5149_v18 = vpop.f32.mrf.mxu0 }
 0x3d5   : > { %v4493_v19 = vpop.f32.mrf.mxu0 }
 0x3d6   : > { %v4227_v19 = vld [vmem:[%s5479_s22 + $0x40] sm:$0xff] }
 0x3d7   : > { %v4520_v20 = vpop.f32.mrf.mxu1 }
 0x3d8   : > { %v1726_v35 = vadd.f32 %v4520_v20, %v4205_v21 }
 0x3d9   : > { %v1720_v23 = vpop.f32.mrf.mxu1 }
 0x3da   : > { %v1721_v24 = vadd.f32 %v4205_v21, %v1720_v23 }
 0x3db   : > { %v4509_v26 = vpop.f32.mrf.mxu0 }
 0x3dc   : > { %4533 = vmatpush3.xpose.msk.msra.mxu1 %vm1229_vm3, %v1721_v24  ;;  %v1638_v36 = vadd.f32 %v4509_v26, %v4197_v27  ;;  %v4240_v24 = vld [vmem:[%s4957_s28 + $0x2] ss:$0 sm:$0xff] }
 0x3dd   : > { %v1632_v30 = vpop.f32.mrf.mxu0  ;;  %4537 = vmatprep.subr.mxu1 %v4803_v32 }
 0x3de   : > { %v1633_v31 = vadd.f32 %v4197_v27, %v1632_v30 }
 0x3e0   : > { %4535 = vmatmul.mubr.msk.f32.vlgmr.msra.gmra.mxu1 %vm1229_vm3, %v1633_v31 }
 0x3e1   : > { %4538 = vmatpush3.xpose.msk.msra.mxu1 %vm1229_vm3, %v1726_v35  ;;  %4539 = vmatprep.mubr.msk.f32.mxu1 %vm4804_vm2, %v4803_v32 }
 0x3e2   : > { %4547 = vmatprep.subr.mxu1 %v4803_v32 }
 0x3e3   : > { %v4531_v57 = vpop.f32.mrf.mxu0 }
 0x3e4   : > { %4540 = vmatmul.mubr.msk.f32.vlgmr.msra.gmra.mxu1 %vm1229_vm3, %v1638_v36  ;;  %v1814_v59 = vadd.f32 %v4531_v57, %v4213_v58 }
 0x3e5   : > { %4549 = vmatprep.mubr.msk.f32.mxu1 %vm4804_vm2, %v4803_v32  ;;  %v1808_v60 = vpop.f32.mrf.mxu0 }
 0x3e6   : > { %v1809_v61 = vadd.f32 %v4213_v58, %v1808_v60  ;;  %4548 = vmatpush3.msra.mxu1 %v1814_v59 }
 0x3e7   : > { %4557 = vmatprep.subr.mxu1 %v1552_v62 }
 0x3e8   : > { %4543 = vmatpush3.msra.mxu0 %v1809_v61 }
 0x3e9   : > { %4552 = vmatprep.subr.mxu0 %v4222_v6 }
 0x4a0   : > { %v1889_v41 = vpop.f32.mrf.mxu1 }
 0x4a1   : > { %v1969_v42 = vsel %vm1229_vm3, %v1889_v41, -inf }
 0x4a2   : > { %1970 = vmax.xlane.f32.xlu0 %v1969_v42  ;;  %v4536_v43 = vpop.f32.mrf.mxu1  ;;  %v4245_v42 = vld [vmem:[%s4962_s1 + $0x50] sm:$0xff] }
 0x4a3   : > { %v4244_v43 = vld [vmem:[%s4962_s1 + $0x48] sm:$0xff] }
 0x4a4   : > { %v1965_v44 = vpop.f32.mrf.mxu1 }
 0x4a5   : > { %v1972_v45 = vsel %vm1229_vm3, %v1965_v44, -inf }
 0x4a6   : > { %1973 = vmax.xlane.f32.xlu1 %v1972_v45  ;;  %v4541_v46 = vpop.f32.mrf.mxu1 }
 0x52b   : > { %v1971_v47 = vpop.xlane.xlu0 %1970 }
 0x52c   : > { %v1975_v48 = vsub.f32 %v1889_v41, %v1971_v47  ;;  %v4246_v41 = vld [vmem:[%s4962_s1 + $0x58] sm:$0xff] }
 0x52e   : > { %v1977_v49 = vmul.f32 1.442695, %v1975_v48 }
 0x52f   : > { %v1974_v50 = vpop.xlane.xlu1 %1973 }
 0x530   : > { %4735 = vpow2.f32 %v1977_v49  ;;  %v1976_v51 = vsub.f32 %v1965_v44, %v1974_v50  ;;  %v4243_v44 = vld [vmem:[%s4962_s1 + $0x40] sm:$0xff] }
 0x532   : > { %v1979_v52 = vmul.f32 1.442695, %v1976_v51 }
 0x534   : > { %4737 = vpow2.f32 %v1979_v52 }
 0x53d   : > { %v4736_v53 = vpop.eup %4735 }
 0x53e   : > { %v1981_v54 = vsel %vm1229_vm3, %v4736_v53, 0.0 }
 0x53f   : > { %1982 = vadd.xlane.f32.xlu0 %v1981_v54 }
 0x541   : > { %v4738_v55 = vpop.eup %4737 }
 0x542   : > { %v1984_v56 = vsel %vm1229_vm3, %v4738_v55, 0.0 }
 0x543   : > { %1985 = vadd.xlane.f32.xlu1 %v1984_v56 }
 0x5c8   : > { %v1983_v63 = vpop.xlane.xlu0 %1982 }
 0x5c9   : > { %4739 = vrcp.f32 %v1983_v63 }
 0x5cc   : > { %v1986_v0 = vpop.xlane.xlu1 %1985 }
 0x5cd   : > { %4741 = vrcp.f32 %v1986_v0 }
 0x5d6   : > { %v4740_v1 = vpop.eup %4739 }
 0x5d7   : > { %v5178_v2 = vmul.f32 %v4740_v1, %v4736_v53 }
 0x5d9   : > { %4545 = vmatmul.mubr.msk.f32.vlgmr.msra.gmra.mxu0 %vm1229_vm3, %v5178_v2 }
 0x5da   : > { %v4742_v3 = vpop.eup %4741  ;;  %4553 = vmatpush3.msra.mxu0 %v4222_v6 }
 0x5db   : > { %v5182_v4 = vmul.f32 %v4742_v3, %v4738_v55  ;;  %4562 = vmatprep.subr.mxu0 %v4230_v10 }
 0x5dd   : > { %4550 = vmatmul.mubr.msk.f32.vlgmr.msra.gmra.mxu1 %vm1229_vm3, %v5182_v4 }
 0x5de   : > { %4559 = vmatprep.mubr.msk.f32.mxu1 %vm1229_vm3, %v5149_v18  ;;  %4558 = vmatpush3.msra.mxu1 %v1552_v62  ;;  %v4228_v18 = vld [vmem:[%s5479_s22 + $0x48] sm:$0xff]  ;;  %v4248_v62 = vld [vmem:[%s4967_s25 + $0x2] ss:$0 sm:$0xff] }
 0x5df   : > { %4573 = vmatprep.subr.mxu1 %v4238_v5 }
 0x5e1   : > { %4560 = vmatmul.mubr.msk.f32.vlgmr.msra.gmra.mxu1 %vm1229_vm3, %v5147_v16  ;;  %v4229_v16 = vld [vmem:[%s5479_s22 + $0x50] sm:$0xff] }
 0x5e2   : > { %4574 = vmatpush3.msra.mxu1 %v4238_v5  ;;  %4581 = vmatprep.mubr.msk.f32.mxu1 %vm940_vm1, %v5077_v28 }
 0x5e3   : > { %4575 = vmatprep.subr.mxu1 %v4237_v8 }
 0x5e4   : > { %4576 = vmatpush3.msra.mxu1 %v4237_v8  ;;  %v1991_v8 = vadd.f32 %v5178_v2, %v5128_v11  ;;  %v4257_v11 = vld [vmem:[%s4977_s21 + $0x10] sm:$0xff]  ;;  %v4271_v2 = vld [vmem:[%s5478_s4 + $0x78] sm:$0xff] }
 0x5e5   : > { %4577 = vmatprep.subr.mxu1 %v4236_v9 }
 0x5e6   : > { %4578 = vmatpush3.msra.mxu1 %v4236_v9 }
 0x5e7   : > { %4579 = vmatprep.subr.mxu1 %v4235_v12 }
 0x5e8   : > { %4580 = vmatpush3.msra.mxu1 %v4235_v12 }
 0x5e9   : > { %4582 = vmatmul.mubr.msk.f32.vlgmr.msra.gmra.mxu1 %vm940_vm1, %v5081_v29  ;;  %4595 = vmatprep.subr.mxu1 %v4803_v32 }
 0x5ea   : > { %4597 = vmatprep.mubr.msk.f32.mxu1 %vm4804_vm2, %v4803_v32 }
 0x699   : > { %v2062_v13 = vpop.f32.mrf.mxu0 }
 0x69a   : > { %4554 = vmatprep.mubr.msk.f32.mxu0 %vm1229_vm3, %v2062_v13  ;;  %v1992_v13 = vadd.f32 %v5182_v4, %v5120_v7  ;;  %v4262_v7 = vld [vmem:[%s5479_s22 + $0x70] sm:$0xff]  ;;  %v4261_v4 = vld [vmem:[%s5479_s22 + $0x68] sm:$0xff] }
 0x69b   : > { %v4546_v14 = vpop.f32.mrf.mxu0 }
 0x69d   : > { %v2135_v15 = vpop.f32.mrf.mxu1 }
 0x69e   : > { %4555 = vmatmul.mubr.msk.f32.vlgmr.msra.gmra.mxu0 %vm1229_vm3, %v2135_v15 }
 0x69f   : > { %4563 = vmatpush3.msra.mxu0 %v4230_v10  ;;  %v4551_v17 = vpop.f32.mrf.mxu1  ;;  %4570 = vmatprep.mubr.msk.f32.mxu0 %vm940_vm1, %v5062_v22 }
 0x6a0   : > { %4564 = vmatprep.subr.mxu0 %v4229_v16  ;;  %v4260_v17 = vld [vmem:[%s5479_s22 + $0x60] sm:$0xff] }
 0x6a1   : > { %4565 = vmatpush3.msra.mxu0 %v4229_v16  ;;  %v5214_v20 = vpop.f32.mrf.mxu1  ;;  %v4263_v16 = vld [vmem:[%s5479_s22 + $0x78] sm:$0xff] }
 0x6a2   : > { %4566 = vmatprep.subr.mxu0 %v4228_v18 }
 0x6a3   : > { %4567 = vmatpush3.msra.mxu0 %v4228_v18  ;;  %v5216_v21 = vpop.f32.mrf.mxu1 }
 0x6a4   : > { %4568 = vmatprep.subr.mxu0 %v4227_v19 }
 0x6a5   : > { %4569 = vmatpush3.msra.mxu0 %v4227_v19 }
 0x6a6   : > { %4571 = vmatmul.mubr.msk.f32.vlgmr.msra.gmra.mxu0 %vm940_vm1, %v5068_v25  ;;  %4584 = vmatprep.subr.mxu0 %v4246_v41 }
 0x6a7   : > { %4592 = vmatprep.mubr.msk.f32.mxu0 %vm940_vm1, %v5088_v33  ;;  %4585 = vmatpush3.msra.mxu0 %v4246_v41 }
 0x6a8   : > { %4586 = vmatprep.subr.mxu0 %v4245_v42 }
 0x6a9   : > { %v4583_v23 = vpop.f32.mrf.mxu1  ;;  %4587 = vmatpush3.msra.mxu0 %v4245_v42 }
 0x6aa   : > { %v2476_v26 = vadd.f32 %v4583_v23, %v4240_v24  ;;  %4588 = vmatprep.subr.mxu0 %v4244_v43 }
 0x6ab   : > { %v2470_v27 = vpop.f32.mrf.mxu1  ;;  %4589 = vmatpush3.msra.mxu0 %v4244_v43  ;;  %v4265_v43 = vld [vmem:[%s5484_s10 + $0x3] ss:$0 sm:$0xff]  ;;  %s4805_s10 = smov [#allocation4]  }
 0x6ac   : > { %v2471_v30 = vadd.f32 %v4240_v24, %v2470_v27  ;;  %4590 = vmatprep.subr.mxu0 %v4243_v44  ;;  %v4270_v24 = vld [vmem:[%s5478_s4 + $0x70] sm:$0xff]  ;;  %v4269_v27 = vld [vmem:[%s5478_s4 + $0x68] sm:$0xff] }
 0x6ad   : > { %4591 = vmatpush3.msra.mxu0 %v4243_v44 }
 0x6ae   : > { %4596 = vmatpush3.xpose.msk.msra.mxu1 %vm1229_vm3, %v2471_v30  ;;  %4593 = vmatmul.mubr.msk.f32.vlgmr.msra.gmra.mxu0 %vm940_vm1, %v5092_v34  ;;  %v4268_v30 = vld [vmem:[%s5478_s4 + $0x60] sm:$0xff] }
 0x6af   : > { %4600 = vmatprep.subr.mxu1 %v4803_v32  ;;  %4605 = vmatprep.subr.mxu0 %v4803_v32 }
 0x6b0   : > { %4607 = vmatprep.mubr.msk.f32.mxu0 %vm4804_vm2, %v4803_v32 }
 0x75e   : > { %v5221_v31 = vpop.f32.mrf.mxu0 }
 0x760   : > { %v5223_v35 = vpop.f32.mrf.mxu0 }
 0x766   : > { %v4572_v36 = vpop.f32.mrf.mxu0 }
 0x767   : > { %v2388_v40 = vadd.f32 %v4572_v36, %v4232_v37  ;;  %v2295_v36 = vadd.f32 %v5216_v21, %v5223_v35  ;;  %v4279_v35 = vld [vmem:[%s4962_s1 + $0x78] sm:$0xff] }
 0x768   : > { %v2382_v38 = vpop.f32.mrf.mxu0 }
 0x769   : > { %v2383_v39 = vadd.f32 %v4232_v37, %v2382_v38 }
 0x76b   : > { %4598 = vmatmul.mubr.msk.f32.vlgmr.msra.gmra.mxu1 %vm1229_vm3, %v2383_v39 }
 0x76c   : > { %4601 = vmatpush3.xpose.msk.msra.mxu1 %vm1229_vm3, %v2476_v26  ;;  %4602 = vmatprep.mubr.msk.f32.mxu1 %vm4804_vm2, %v4803_v32 }
 0x76d   : > { %4610 = vmatprep.subr.mxu1 %v4803_v32 }
 0x76e   : > { %v4594_v61 = vpop.f32.mrf.mxu0 }
 0x76f   : > { %4603 = vmatmul.mubr.msk.f32.vlgmr.msra.gmra.mxu1 %vm1229_vm3, %v2388_v40  ;;  %v2564_v63 = vadd.f32 %v4594_v61, %v4248_v62 }
 0x770   : > { %4612 = vmatprep.mubr.msk.f32.mxu1 %vm4804_vm2, %v4803_v32  ;;  %v2558_v0 = vpop.f32.mrf.mxu0 }
 0x771   : > { %v2559_v1 = vadd.f32 %v4248_v62, %v2558_v0  ;;  %4611 = vmatpush3.msra.mxu1 %v2564_v63  ;;  %v4281_v0 = vld [vmem:[%s4967_s25 + $0x3] ss:$0 sm:$0xff]  ;;  %s5485_s25 = scalar_lea.vmem %s5421_s12, %s4935_s29 }
 0x772   : > { %4620 = vmatprep.subr.mxu1 %v4263_v16 }
 0x773   : > { %4606 = vmatpush3.msra.mxu0 %v2559_v1 }
 0x774   : > { %4615 = vmatprep.subr.mxu0 %v4257_v11 }
 0x82b   : > { %v2639_v45 = vpop.f32.mrf.mxu1 }
 0x82c   : > { %v2719_v46 = vsel %vm1229_vm3, %v2639_v45, -inf }
 0x82d   : > { %2720 = vmax.xlane.f32.xlu0 %v2719_v46  ;;  %v4599_v47 = vpop.f32.mrf.mxu1  ;;  %v4278_v46 = vld [vmem:[%s4962_s1 + $0x70] sm:$0xff] }
 0x82e   : > { %v4277_v47 = vld [vmem:[%s4962_s1 + $0x68] sm:$0xff] }
 0x82f   : > { %v2715_v48 = vpop.f32.mrf.mxu1 }
 0x830   : > { %v2722_v49 = vsel %vm1229_vm3, %v2715_v48, -inf }
 0x831   : > { %2723 = vmax.xlane.f32.xlu1 %v2722_v49  ;;  %v4604_v50 = vpop.f32.mrf.mxu1 }
 0x8b6   : > { %v2721_v51 = vpop.xlane.xlu0 %2720 }
 0x8b7   : > { %v2725_v52 = vsub.f32 %v2639_v45, %v2721_v51 }
 0x8b9   : > { %v2727_v53 = vmul.f32 1.442695, %v2725_v52 }
 0x8ba   : > { %v2724_v54 = vpop.xlane.xlu1 %2723 }
 0x8bb   : > { %4743 = vpow2.f32 %v2727_v53  ;;  %v2726_v55 = vsub.f32 %v2715_v48, %v2724_v54  ;;  %v4276_v48 = vld [vmem:[%s4962_s1 + $0x60] sm:$0xff] }
 0x8bd   : > { %v2729_v56 = vmul.f32 1.442695, %v2726_v55 }
 0x8bf   : > { %4745 = vpow2.f32 %v2729_v56 }
 0x8c8   : > { %v4744_v57 = vpop.eup %4743 }
 0x8c9   : > { %v2731_v58 = vsel %vm1229_vm3, %v4744_v57, 0.0 }
 0x8ca   : > { %2732 = vadd.xlane.f32.xlu0 %v2731_v58 }
 0x8cc   : > { %v4746_v59 = vpop.eup %4745 }
 0x8cd   : > { %v2734_v60 = vsel %vm1229_vm3, %v4746_v59, 0.0 }
 0x8ce   : > { %2735 = vadd.xlane.f32.xlu1 %v2734_v60 }
 0x953   : > { %v2733_v3 = vpop.xlane.xlu0 %2732 }
 0x954   : > { %4747 = vrcp.f32 %v2733_v3 }
 0x957   : > { %v2736_v5 = vpop.xlane.xlu1 %2735 }
 0x958   : > { %4749 = vrcp.f32 %v2736_v5 }
 0x961   : > { %v4748_v6 = vpop.eup %4747 }
 0x962   : > { %v2738_v9 = vmul.f32 %v4748_v6, %v4744_v57 }
 0x964   : > { %4608 = vmatmul.mubr.msk.f32.vlgmr.msra.gmra.mxu0 %vm1229_vm3, %v2738_v9  ;;  %v5251_v10 = vadd.f32 %v2738_v9, %v1991_v8 }
 0x965   : > { %v4750_v12 = vpop.eup %4749  ;;  %4616 = vmatpush3.msra.mxu0 %v4257_v11 }
 0x966   : > { %v2740_v14 = vmul.f32 %v4750_v12, %v4746_v59  ;;  %4631 = vmatprep.subr.mxu0 %v4271_v2 }
 0x968   : > { %4613 = vmatmul.mubr.msk.f32.vlgmr.msra.gmra.mxu1 %vm1229_vm3, %v2740_v14  ;;  %v5256_v15 = vadd.f32 %v2740_v14, %v1992_v13 }
 0x969   : > { %4628 = vmatprep.mubr.msk.f32.mxu1 %vm940_vm1, %v5062_v22  ;;  %4621 = vmatpush3.msra.mxu1 %v4263_v16 }
 0x96a   : > { %4622 = vmatprep.subr.mxu1 %v4262_v7 }
 0x96b   : > { %4623 = vmatpush3.msra.mxu1 %v4262_v7 }
 0x96c   : > { %4624 = vmatprep.subr.mxu1 %v4261_v4 }
 0x96d   : > { %4625 = vmatpush3.msra.mxu1 %v4261_v4  ;;  %v4290_v4 = vld [vmem:[%s4977_s21 + $0x18] sm:$0xff] }
 0x96e   : > { %4626 = vmatprep.subr.mxu1 %v4260_v17 }
 0x96f   : > { %4627 = vmatpush3.msra.mxu1 %v4260_v17 }
 0x970   : > { %4629 = vmatmul.mubr.msk.f32.vlgmr.msra.gmra.mxu1 %vm940_vm1, %v5068_v25  ;;  %4642 = vmatprep.subr.mxu1 %v4279_v35 }
 0x971   : > { %4650 = vmatprep.mubr.msk.f32.mxu1 %vm940_vm1, %v5088_v33  ;;  %4643 = vmatpush3.msra.mxu1 %v4279_v35  ;;  %v3705_v35 = vld [vmem:[%s4990_s9] sm:$0xff] }
 0x972   : > { %4644 = vmatprep.subr.mxu1 %v4278_v46 }
 0x973   : > { %4645 = vmatpush3.msra.mxu1 %v4278_v46  ;;  %v3806_v46 = vld [vmem:[%s5000_s11 + $0x38] sm:$0xff] }
 0x974   : > { %4646 = vmatprep.subr.mxu1 %v4277_v47 }
 0x975   : > { %4647 = vmatpush3.msra.mxu1 %v4277_v47  ;;  %v3805_v47 = vld [vmem:[%s5000_s11 + $0x30] sm:$0xff] }
 0x976   : > { %4648 = vmatprep.subr.mxu1 %v4276_v48 }
 0x977   : > { %4649 = vmatpush3.msra.mxu1 %v4276_v48  ;;  %v3804_v48 = vld [vmem:[%s5000_s11 + $0x28] sm:$0xff] }
 0x978   : > { %4651 = vmatmul.mubr.msk.f32.vlgmr.msra.gmra.mxu1 %vm940_vm1, %v5092_v34  ;;  %4663 = vmatprep.subr.mxu1 %v4803_v32 }
 0x979   : > { %4665 = vmatprep.mubr.msk.f32.mxu1 %vm4804_vm2, %v4803_v32 }
 0xa24   : > { %v2812_v18 = vpop.f32.mrf.mxu0 }
 0xa25   : > { %4617 = vmatprep.mubr.msk.f32.mxu0 %vm1229_vm3, %v2812_v18 }
 0xa26   : > { %v4609_v19 = vpop.f32.mrf.mxu0 }
 0xa28   : > { %v2885_v23 = vpop.f32.mrf.mxu1 }
 0xa29   : > { %4618 = vmatmul.mubr.msk.f32.vlgmr.msra.gmra.mxu0 %vm1229_vm3, %v2885_v23 }
 0xa2a   : > { %4632 = vmatpush3.msra.mxu0 %v4271_v2  ;;  %v4614_v26 = vpop.f32.mrf.mxu1  ;;  %4639 = vmatprep.mubr.msk.f32.mxu0 %vm940_vm1, %v5077_v28  ;;  %v2300_v28 = vadd.f32 %v5214_v20, %v5221_v31 }
 0xa2b   : > { %4633 = vmatprep.subr.mxu0 %v4270_v24 }
 0xa2c   : > { %4634 = vmatpush3.msra.mxu0 %v4270_v24 }
 0xa2d   : > { %4635 = vmatprep.subr.mxu0 %v4269_v27 }
 0xa2e   : > { %4636 = vmatpush3.msra.mxu0 %v4269_v27 }
 0xa2f   : > { %4637 = vmatprep.subr.mxu0 %v4268_v30 }
 0xa30   : > { %4638 = vmatpush3.msra.mxu0 %v4268_v30  ;;  %v4630_v40 = vpop.f32.mrf.mxu1 }
 0xa31   : > { %4640 = vmatmul.mubr.msk.f32.vlgmr.msra.gmra.mxu0 %vm940_vm1, %v5081_v29  ;;  %4653 = vmatprep.subr.mxu0 %v4803_v32  ;;  %v4273_v29 = vld [vmem:[%s4957_s28 + $0x3] ss:$0 sm:$0xff]  ;;  %v3059_v31 = vadd.f32 %v4630_v40, %v4265_v43  ;;  %s3953_s28 = sshll.u32 %s4805_s10, 4  ;;  %s3954_s28 = int_to_ptr.vmem [resolvable:$true] %s3953_s28 }
 0xa32   : > { %4655 = vmatprep.mubr.msk.f32.mxu0 %vm4804_vm2, %v4803_v32  ;;  %v3053_v45 = vpop.f32.mrf.mxu1  ;;  %s4767_s1 = scalar_lea.vmem %s3954_s28, 256  ;;  %p4774_p9 = scmp.lt.s32.totalorder %s3954_s28, %s3954_s28 }
 0xa33   : > { %v3054_v20 = vadd.f32 %v4265_v43, %v3053_v45  ;;  %p4768_p6 = scmp.ne.s32.totalorder %s3954_s28, %s4767_s1  ;;  %p4775_p10 = scmp.lt.s32.totalorder %s4767_s1, %s4767_s1 }
 0xa35   : > { %p4769_p7 = pnand %p4768_p6, %p4712_p5  ;;  %p4776_p11 = por %p4775_p10, %p4774_p9 }
 0xa37   : > { %p4770_p8 = pneg %p4769_p7 }
 0xa38   : > { %v4652_v63 = vpop.f32.mrf.mxu1 }
 0xa39   : > { %v3235_v1 = vadd.f32 %v4652_v63, %v4281_v0  ;;  %p4777_p12 = pnand %p4776_p11, %p4770_p8 }
 0xa3a   : > { %v3229_v3 = vpop.f32.mrf.mxu1 }
 0xa3b   : > { %v3230_v5 = vadd.f32 %v4281_v0, %v3229_v3  ;;  %v3802_v0 = vld [vmem:[%s5000_s11 + $0x18] sm:$0xff]  ;;  %v3800_v3 = vld [vmem:[%s5000_s11 + $0x8] sm:$0xff] }
 0xa3d   : > { %4664 = vmatpush3.msra.mxu1 %v3230_v5  ;;  %v3799_v5 = vld [vmem:[%s5000_s11] sm:$0xff] }
 0xa3e   : > { %4673 = vmatprep.subr.mxu1 %v4290_v4 }
 0xae9   : > { %v4619_v33 = vpop.f32.mrf.mxu0 }
 0xaea   : > { %v5286_v37 = vadd.f32 %v4619_v33, %v2300_v28 }
 0xaeb   : > { %v2963_v38 = vpop.f32.mrf.mxu0 }
 0xaec   : > { %v5288_v39 = vadd.f32 %v2963_v38, %v2295_v36 }
 0xaf1   : > { %v4641_v41 = vpop.f32.mrf.mxu0 }
 0xaf2   : > { %v3147_v21 = vadd.f32 %v4641_v41, %v4273_v29 }
 0xaf3   : > { %v3141_v42 = vpop.f32.mrf.mxu0 }
 0xaf4   : > { %v3142_v44 = vadd.f32 %v4273_v29, %v3141_v42 }
 0xaf6   : > { %4654 = vmatpush3.xpose.msk.msra.mxu0 %vm1229_vm3, %v3142_v44 }
 0xaf7   : > { %4658 = vmatprep.subr.mxu0 %v4803_v32 }
 0xaf9   : > { %4656 = vmatmul.mubr.msk.f32.vlgmr.msra.gmra.mxu0 %vm1229_vm3, %v3054_v20  ;;  %v3708_v20 = vld [vmem:[%s4990_s9 + $0x18] sm:$0xff] }
 0xafa   : > { %4659 = vmatpush3.xpose.msk.msra.mxu0 %vm1229_vm3, %v3147_v21  ;;  %4660 = vmatprep.mubr.msk.f32.mxu0 %vm4804_vm2, %v4803_v32  ;;  %v3707_v21 = vld [vmem:[%s4990_s9 + $0x10] sm:$0xff] }
 0xafb   : > { %4668 = vmatprep.subr.mxu0 %v4803_v32 }
 0xafd   : > { %4661 = vmatmul.mubr.msk.f32.vlgmr.msra.gmra.mxu0 %vm1229_vm3, %v3059_v31  ;;  %v3706_v31 = vld [vmem:[%s4990_s9 + $0x8] sm:$0xff] }
 0xafe   : > { %4670 = vmatprep.mubr.msk.f32.mxu0 %vm4804_vm2, %v4803_v32  ;;  %4669 = vmatpush3.msra.mxu0 %v3235_v1  ;;  %v3801_v1 = vld [vmem:[%s5000_s11 + $0x10] sm:$0xff] }
 0xaff   : > { %4678 = vmatprep.subr.mxu0 %v3708_v20 }
 0xbb9   : > { %v3310_v49 = vpop.f32.mrf.mxu0 }
 0xbba   : > { %v3390_v50 = vsel %vm1229_vm3, %v3310_v49, -inf }
 0xbbb   : > { %3391 = vmax.xlane.f32.xlu0 %v3390_v50  ;;  %v4657_v51 = vpop.f32.mrf.mxu0 }
 0xbbd   : > { %v3386_v52 = vpop.f32.mrf.mxu0 }
 0xbbe   : > { %v3393_v53 = vsel %vm1229_vm3, %v3386_v52, -inf }
 0xbbf   : > { %3394 = vmax.xlane.f32.xlu1 %v3393_v53  ;;  %v4662_v54 = vpop.f32.mrf.mxu0 }
 0xc44   : > { %v3392_v55 = vpop.xlane.xlu0 %3391 }
 0xc45   : > { %v3396_v56 = vsub.f32 %v3310_v49, %v3392_v55  ;;  %v3803_v49 = vld [vmem:[%s5000_s11 + $0x20] sm:$0xff]  ;;  %s5489_s11 = scalar_lea.vmem %s5427_s18, %s4935_s29 }
 0xc47   : > { %v3398_v57 = vmul.f32 1.442695, %v3396_v56 }
 0xc48   : > { %v3395_v34 = vpop.xlane.xlu1 %3394 }
 0xc49   : > { %4751 = vpow2.f32 %v3398_v57  ;;  %v3397_v58 = vsub.f32 %v3386_v52, %v3395_v34  ;;  %v4294_v34 = vld [vmem:[%s5486_s5] ss:$0 sm:$0xff] }
 0xc4b   : > { %v3400_v59 = vmul.f32 1.442695, %v3397_v58 }
 0xc4d   : > { %4753 = vpow2.f32 %v3400_v59 }
 0xc56   : > { %v4752_v32 = vpop.eup %4751 }
 0xc57   : > { %v3402_v60 = vsel %vm1229_vm3, %v4752_v32, 0.0 }
 0xc58   : > { %3403 = vadd.xlane.f32.xlu0 %v3402_v60 }
 0xc5a   : > { %v4754_v61 = vpop.eup %4753 }
 0xc5b   : > { %v3405_v62 = vsel %vm1229_vm3, %v4754_v61, 0.0 }
 0xc5c   : > { %3406 = vadd.xlane.f32.xlu1 %v3405_v62 }
 0xce1   : > { %v3404_v6 = vpop.xlane.xlu0 %3403 }
 0xce2   : > { %4755 = vrcp.f32 %v3404_v6  ;;  %v4296_v6 = vld [vmem:[%s5488_s30] ss:$0 sm:$0xff] }
 0xce5   : > { %v3407_v8 = vpop.xlane.xlu1 %3406 }
 0xce6   : > { %4757 = vrcp.f32 %v3407_v8 }
 0xcef   : > { %v4756_v9 = vpop.eup %4755 }
 0xcf0   : > { %v3409_v12 = vmul.f32 %v4756_v9, %v4752_v32 }
 0xcf2   : > { %4666 = vmatmul.mubr.msk.f32.vlgmr.msra.gmra.mxu1 %vm1229_vm3, %v3409_v12  ;;  %v3412_v13 = vadd.f32 %v3409_v12, %v5251_v10 }
 0xcf3   : > { %v4758_v14 = vpop.eup %4757  ;;  %4674 = vmatpush3.msra.mxu1 %v4290_v4 }
 0xcf4   : > { %v3411_v11 = vmul.f32 %v4758_v14, %v4754_v61  ;;  %v3645_v2 = vmul.f32 0.25, %v3412_v13  ;;  %4689 = vmatprep.subr.mxu1 %v3806_v46  ;;  %v4295_v61 = vld [vmem:[%s5487_s7] ss:$0 sm:$0xff] }
 0xcf6   : > { %4671 = vmatmul.mubr.msk.f32.vlgmr.msra.gmra.mxu0 %vm1229_vm3, %v3411_v11  ;;  %v3413_v16 = vadd.f32 %v3411_v11, %v5256_v15  ;;  %3647 = vst.msk [vmem:[#allocation4] sm:$0xff] %vm1229_vm3, %v3645_v2  ;;  %v4293_v15 = vld [vmem:[%s5485_s25] ss:$0 sm:$0xff] }
 0xcf7   : > { %4679 = vmatpush3.msra.mxu0 %v3708_v20  ;;  %v4299_v2 = vld [vmem:[%s5489_s11] ss:$0 sm:$0xff] }
 0xcf8   : > { %v3646_v7 = vmul.f32 0.25, %v3413_v16  ;;  %4680 = vmatprep.subr.mxu0 %v3707_v21 }
 0xcf9   : > { %4681 = vmatpush3.msra.mxu0 %v3707_v21 }
 0xcfa   : > { %3648 = vst.msk [vmem:[#allocation4 + $0x8] sm:$0xff] %vm1229_vm3, %v3646_v7  ;;  %4682 = vmatprep.subr.mxu0 %v3706_v31 }
 0xcfb   : > { %4683 = vmatpush3.msra.mxu0 %v3706_v31 }
 0xcfc   : > { %4684 = vmatprep.subr.mxu0 %v3705_v35 }
 0xcfd   : > { %4685 = vmatpush3.msra.mxu0 %v3705_v35 }
 0xdb2   : > { %v3483_v17 = vpop.f32.mrf.mxu1 }
 0xdb3   : > { %4675 = vmatprep.mubr.msk.f32.mxu1 %vm1229_vm3, %v3483_v17 }
 0xdb4   : > { %v4667_v10 = vpop.f32.mrf.mxu1 }
 0xdb6   : > { %v3556_v18 = vpop.f32.mrf.mxu0 }
 0xdb7   : > { %4676 = vmatmul.mubr.msk.f32.vlgmr.msra.gmra.mxu1 %vm1229_vm3, %v3556_v18 }
 0xdb8   : > { %v4672_v19 = vpop.f32.mrf.mxu0  ;;  %4690 = vmatpush3.msra.mxu1 %v3806_v46 }
 0xdb9   : > { %4691 = vmatprep.subr.mxu1 %v3805_v47 }
 0xdba   : > { %4692 = vmatpush3.msra.mxu1 %v3805_v47 }
 0xdbb   : > { %4693 = vmatprep.subr.mxu1 %v3804_v48 }
 0xdbc   : > { %4694 = vmatpush3.msra.mxu1 %v3804_v48 }
 0xdbd   : > { %4695 = vmatprep.subr.mxu1 %v3803_v49 }
 0xdbe   : > { %4696 = vmatpush3.msra.mxu1 %v3803_v49 }
 0xdbf   : > { %4697 = vmatprep.subr.mxu1 %v3802_v0 }
 0xdc0   : > { %4698 = vmatpush3.msra.mxu1 %v3802_v0 }
 0xdc1   : > { %4699 = vmatprep.subr.mxu1 %v3801_v1 }
 0xdc2   : > { %4700 = vmatpush3.msra.mxu1 %v3801_v1 }
 0xdc3   : > { %4701 = vmatprep.subr.mxu1 %v3800_v3 }
 0xdc4   : > { %4702 = vmatpush3.msra.mxu1 %v3800_v3 }
 0xdc5   : > { %4703 = vmatprep.subr.mxu1 %v3799_v5 }
 0xdc6   : > { %4704 = vmatpush3.msra.mxu1 %v3799_v5 }
 0xe77   : > { %v4677_v23 = vpop.f32.mrf.mxu1 }
 0xe78   : > { %v3644_v24 = vadd.f32 %v4677_v23, %v5286_v37 }
 0xe79   : > { %v3634_v26 = vpop.f32.mrf.mxu1 }
 0xe7a   : > { %v3657_v27 = vadd.f32 %v4293_v15, %v3644_v24  ;;  %v3643_v30 = vadd.f32 %v3634_v26, %v5288_v39 }
 0xe7c   : > { %v3656_v28 = vadd.f32 %v4293_v15, %v3643_v30  ;;  %v3659_v33 = vadd.f32 %v3657_v27, %v5068_v25 }
 0xe7e   : > { %v3663_v36 = vsel %vm940_vm1, %v3659_v33, 0.0  ;;  %v3658_v38 = vadd.f32 %v3656_v28, %v5062_v22 }
 0xe7f   : > { %3664 = vadd.xlane.f32.xlu1 %v3663_v36 }
 0xe80   : > { %v3660_v40 = vsel %vm940_vm1, %v3658_v38, 0.0 }
 0xe81   : > { %3661 = vadd.xlane.f32.xlu0 %v3660_v40 }
 0xf08   : > { %v3665_v41 = vpop.xlane.xlu1 %3664 }
 0xf09   : > { %v3668_v37 = vmul.f32 0.03125, %v3665_v41 }
 0xf0a   : > { %v3662_v29 = vpop.xlane.xlu0 %3661 }
 0xf0b   : > { %v3670_v42 = vsub.f32 %v3659_v33, %v3668_v37  ;;  %v3667_v39 = vmul.f32 0.03125, %v3662_v29 }
 0xf0d   : > { %v3669_v43 = vsub.f32 %v3658_v38, %v3667_v39  ;;  %v3672_v44 = vmul.f32 %v3670_v42, %v3670_v42 }
 0xf0f   : > { %v3676_v25 = vsel %vm940_vm1, %v3672_v44, 0.0  ;;  %v3671_v45 = vmul.f32 %v3669_v43, %v3669_v43 }
 0xf10   : > { %3677 = vadd.xlane.f32.xlu1 %v3676_v25 }
 0xf11   : > { %v3673_v22 = vsel %vm940_vm1, %v3671_v45, 0.0 }
 0xf12   : > { %3674 = vadd.xlane.f32.xlu0 %v3673_v22 }
 0xf99   : > { %v3678_v50 = vpop.xlane.xlu1 %3677 }
 0xf9a   : > { %v3680_v51 = vmul.f32 0.03125, %v3678_v50 }
 0xf9b   : > { %v3675_v52 = vpop.xlane.xlu0 %3674 }
 0xf9c   : > { %v3682_v53 = vadd.f32 1e-05, %v3680_v51  ;;  %v3679_v54 = vmul.f32 0.03125, %v3675_v52 }
 0xf9e   : > { %4759 = vrsqrt.f32 %v3682_v53  ;;  %v3681_v55 = vadd.f32 1e-05, %v3679_v54 }
 0xfa0   : > { %4761 = vrsqrt.f32 %v3681_v55 }
 0xfab   : > { %v4760_v56 = vpop.eup %4759 }
 0xfac   : > { %v3686_v57 = vmul.f32 %v4760_v56, %v3670_v42 }
 0xfad   : > { %v4762_v58 = vpop.eup %4761 }
 0xfae   : > { %v3685_v59 = vmul.f32 %v4762_v58, %v3669_v43  ;;  %v3695_v32 = vmul.f32 %v4294_v34, %v3686_v57 }
 0xfb0   : > { %v3694_v60 = vmul.f32 %v4294_v34, %v3685_v59  ;;  %v3704_v63 = vadd.f32 %v4295_v61, %v3695_v32 }
 0xfb2   : > { %v3703_v62 = vadd.f32 %v4295_v61, %v3694_v60 }
 0xfb4   : > { %4686 = vmatprep.mubr.msk.f32.mxu0 %vm940_vm1, %v3703_v62 }
 0xfb5   : > { %4687 = vmatmul.mubr.msk.f32.vlgmr.msra.gmra.mxu0 %vm940_vm1, %v3704_v63 }
0x1075   : > { %v4688_v8 = vpop.f32.mrf.mxu0 }
0x1076   : > { %v3794_v9 = vadd.f32 %v4688_v8, %v4296_v6 }
0x1077   : > { %v3788_v12 = vpop.f32.mrf.mxu0 }
0x1078   : > { %v3789_v13 = vadd.f32 %v4296_v6, %v3788_v12  ;;  %v3798_v11 = vmax.f32 %v3794_v9, 0.0 }
0x107a   : > { %v3797_v14 = vmax.f32 %v3789_v13, 0.0 }
0x107c   : > { %4705 = vmatprep.mubr.msk.f32.mxu1 %vm3814_vm4, %v3797_v14 }
0x107d   : > { %4706 = vmatmul.mubr.msk.f32.vlgmr.msra.gmra.mxu1 %vm3814_vm4, %v3798_v11 }
0x113d   : > { %v4707_v16 = vpop.f32.mrf.mxu1 }
0x113e   : > { %v3893_v7 = vadd.f32 %v4707_v16, %v4299_v2 }
0x113f   : > { %v3887_v4 = vpop.f32.mrf.mxu1 }
0x1140   : > { %v3888_v17 = vadd.f32 %v4299_v2, %v3887_v4  ;;  %v3897_v10 = vadd.f32 %v3893_v7, %v3704_v63 }
0x1142   : > { %v3901_v18 = vsel %vm940_vm1, %v3897_v10, 0.0  ;;  %v3896_v19 = vadd.f32 %v3888_v17, %v3703_v62 }
0x1143   : > { %3902 = vadd.xlane.f32.xlu1 %v3901_v18 }
0x1144   : > { %v3898_v23 = vsel %vm940_vm1, %v3896_v19, 0.0 }
0x1145   : > { %3899 = vadd.xlane.f32.xlu0 %v3898_v23 }
0x11cc   : > { %v3903_v15 = vpop.xlane.xlu1 %3902 }
0x11cd   : > { %v3905_v24 = vmul.f32 0.03125, %v3903_v15 }
0x11ce   : > { %v3900_v26 = vpop.xlane.xlu0 %3899 }
0x11cf   : > { %v3907_v27 = vsub.f32 %v3897_v10, %v3905_v24  ;;  %v3904_v30 = vmul.f32 0.03125, %v3900_v26 }
0x11d1   : > { %v3906_v28 = vsub.f32 %v3896_v19, %v3904_v30  ;;  %v3909_v33 = vmul.f32 %v3907_v27, %v3907_v27 }
0x11d3   : > { %v3913_v36 = vsel %vm940_vm1, %v3909_v33, 0.0  ;;  %v3908_v38 = vmul.f32 %v3906_v28, %v3906_v28 }
0x11d4   : > { %3914 = vadd.xlane.f32.xlu1 %v3913_v36 }
0x11d5   : > { %v3910_v40 = vsel %vm940_vm1, %v3908_v38, 0.0 }
0x11d6   : > { %3911 = vadd.xlane.f32.xlu0 %v3910_v40 }
0x11d7   : > { %4780 = shalt.err (!%p4777_p12)
}
0x11d8   : > { %s4806_s25 = smov 128   ;;  %s4807_s9 = smov 8  }
0x11d9   : > { %s5491_s4 = sld [smem:[#allocation25_spill]]  ;;  %s5492_s27 = scalar_lea.vmem %s5428_s19, %s4935_s29 }
0x11da   : > { %v4302_v25 = vld [vmem:[%s5492_s27] ss:$0 sm:$0xff]  ;;  %s5493_s0 = scalar_lea.vmem %s5429_s20, %s4935_s29 }
0x11db   : > { %v4303_v20 = vld [vmem:[%s5493_s0] ss:$0 sm:$0xff] }
0x11df   : > { %4709 = dma.vmem_to_hbm [thread:$0]  (%p4712_p5), %s3954_s28, 256, %s5491_s4, [#allocation5], %s4806_s25, %s4806_s25, %s4807_s9  }
0x125d   : > { %v3915_v41 = vpop.xlane.xlu1 %3914 }
0x125e   : > { %v3917_v37 = vmul.f32 0.03125, %v3915_v41 }
0x125f   : > { %v3912_v29 = vpop.xlane.xlu0 %3911 }
0x1260   : > { %v3919_v42 = vadd.f32 1e-05, %v3917_v37  ;;  %v3916_v39 = vmul.f32 0.03125, %v3912_v29 }
0x1262   : > { %4763 = vrsqrt.f32 %v3919_v42  ;;  %v3918_v43 = vadd.f32 1e-05, %v3916_v39 }
0x1264   : > { %4765 = vrsqrt.f32 %v3918_v43 }
0x126f   : > { %v4764_v44 = vpop.eup %4763 }
0x1270   : > { %v3923_v45 = vmul.f32 %v4764_v44, %v3907_v27 }
0x1271   : > { %v4766_v22 = vpop.eup %4765 }
0x1272   : > { %v3932_v21 = vmul.f32 %v4302_v25, %v3923_v45  ;;  %v3922_v31 = vmul.f32 %v4766_v22, %v3906_v28 }
0x1274   : > { %v3941_v35 = vadd.f32 %v4303_v20, %v3932_v21  ;;  %v3931_v46 = vmul.f32 %v4302_v25, %v3922_v31 }
0x1276   : > { %3943 = vst.msk [vmem:[%s5481_s2 + $0x8] sm:$0xff] %vm940_vm1, %v3941_v35  ;;  %v3940_v47 = vadd.f32 %v4303_v20, %v3931_v46 }
0x1278   : > { %3942 = vst.msk [vmem:[%s5481_s2] sm:$0xff] %vm940_vm1, %v3940_v47 }
0x1279   : > { %4796 = dma.done.wait (%p4712_p5), [#allocation5], 256  }
0x127a   : > { %4798 = vsyncadd (%p4712_p5), [#allocation5], 4294967040 }
0x127b PF: > { %s5494_s29 = sld [smem:[#allocation7_spill]] }
0x1281   : > { %s34_s3 = sadd.s32 1, %s5494_s29  }
0x1282   : > { %p31_p13 = scmp.ge.s32.totalorder %s34_s3, 4  }
0x1284   :  { %33 = sbr.rel (!%p31_p13) target bundleno = 16 (0x10), region = 209 }
0x1289   :  { %3972 = vsyncpa [#allocation5], 1 }
0x128a   :  { %3974 = vsyncpa [#allocation5 + $0x1], 1 }

</bundles_post_ra>
